<compile_context>
chip_gen: v5e
topology: v5e:2x2
jax: 0.10.0
libtpu: 0.0.40
codegen_flags: <defaults>
</compile_context>

<pallas_src>
import functools
import math

import jax
import jax.numpy as jnp
import numpy as np
from jax.experimental import pallas as pl
from jax.experimental.pallas import tpu as pltpu

EPS = 1e-5
K_SUBLANE_ALIGN = 16           # bf16 sublane pack alignment for the contraction rows
KB_MAX_SINGLE = 4096           # stream the contraction in chunks above this
KB_CHUNK = 2048


def _round_up(x, m):
    return (x + m - 1) // m * m


@functools.lru_cache(maxsize=1)
def _tpu_config():
    """(two_tensorcores, vmem_limit_bytes) for the attached TPU generation."""
    kind = ""
    try:
        kind = (getattr(jax.devices()[0], "device_kind", "") or "").lower()
    except Exception:
        pass
    two_tc = ("v7" in kind) or ("v4" in kind)      # megacore-style 2 TC per device
    if "v7" in kind:
        vmem = 48 * 1024 * 1024                    # 64 MiB physical -> keep headroom
    elif ("v5" in kind) or ("v6" in kind):
        vmem = 96 * 1024 * 1024                    # 128 MiB physical
    else:
        vmem = 32 * 1024 * 1024
    return two_tc, vmem


def _divisor_tiles(M, step):
    return [t for t in range(step, M + 1, step) if M % t == 0]


def _choose_tm(M, *, pool_w, two_tc, k_rows, vmem_limit, target=2048):
    """Lane tile: multiple of 128 (or full M), divides M, fits a VMEM budget.

    With a fused 2x2 pool the tile must also keep the pooled output block lane-dense
    (tm % 512 == 0) and pool-row aligned (tm % (2W) == 0), or cover all of M.
    On 2-TensorCore parts prefer a 2-way split so the "parallel" M axis can shard;
    on 1-TC parts take the largest tile (fewer ~600-cycle grid steps).
    """
    budget = max(128, (vmem_limit // (12 * max(k_rows, 1))) // 128 * 128)
    cap = min(target, budget)
    if pool_w is None:
        cands = _divisor_tiles(M, 128)
    else:
        step = math.lcm(2 * pool_w, 512)
        cands = _divisor_tiles(M, step)
        if M not in cands:
            cands.append(M)
    if not cands:
        cands = [M]
    if two_tc:
        cap = min(cap, max(min(cands), M // 2))
    picks = [c for c in cands if c <= cap]
    return max(picks) if picks else min(cands)


def _pool_matrix(tm, width):
    """Constant (tm, tm//4) matrix: 2x2/stride-2 average pool over lanes ordered
    (..., h, w) with row width `width` (tile starts are 2*width aligned)."""
    wo = width // 2
    lanes = np.arange(tm)
    col = (lanes // width // 2) * wo + (lanes % width) // 2
    P = np.zeros((tm, tm // 4), np.float32)
    P[lanes, col] = 0.25
    return jnp.asarray(P)


# --------------------------------------------------------------------------
# Fused conv kernel (channel-major / transposed GEMM):
#   out = pool?( relu?( W @ preact(A) * scale + shift [+ residual] ) )
# W: (Cout, K) bf16, A: (K, tm) bf16, scale/shift: (Cout, 1) f32,
# pre-activation scale/shift: (K, 1) f32, residual: (Cout, tm), pool: (tm, tm//4).
# --------------------------------------------------------------------------
def _conv_kernel(*refs, relu, has_pre, has_res, has_pool, multi_k):
    it = iter(refs)
    w_ref = next(it)
    a_ref = next(it)
    s_ref = next(it)
    t_ref = next(it)
    ps_ref = next(it) if has_pre else None
    pt_ref = next(it) if has_pre else None
    r_ref = next(it) if has_res else None
    p_ref = next(it) if has_pool else None
    o_ref = next(it)
    acc_ref = next(it) if multi_k else None

    a = a_ref[...]
    if has_pre:                                    # fused leading BN + ReLU (per K row)
        a = jnp.maximum(a.astype(jnp.float32) * ps_ref[...] + pt_ref[...], 0.0)
        a = a.astype(jnp.bfloat16)
    y = jnp.dot(w_ref[...], a, preferred_element_type=jnp.float32)

    def epilogue(acc):
        z = acc * s_ref[...] + t_ref[...]          # conv bias + folded BatchNorm
        if has_res:
            z = z + r_ref[...].astype(jnp.float32)
        if relu:
            z = jnp.maximum(z, 0.0)
        if has_pool:                               # fused 2x2 avg-pool over lanes
            z = jnp.dot(z, p_ref[...], preferred_element_type=jnp.float32)
        o_ref[...] = z.astype(o_ref.dtype)

    if not multi_k:                                # nk == 1: no scratch, no pl.when
        epilogue(y)
    else:
        @pl.when(pl.program_id(1) == 0)
        def _init():
            acc_ref[...] = jnp.zeros_like(acc_ref)

        acc_ref[...] += y

        @pl.when(pl.program_id(1) == pl.num_programs(1) - 1)
        def _fin():
            epilogue(acc_ref[...])


def fused_conv(a, w, scale, shift, *, relu, residual=None,
               pre_scale=None, pre_shift=None, pool_width=None,
               out_dtype=jnp.bfloat16):
    K, M = a.shape
    Cout, Kw = w.shape
    assert Kw == K, (Kw, K)
    two_tc, vmem_limit = _tpu_config()

    a = a.astype(jnp.bfloat16)
    w = w.astype(jnp.bfloat16)
    scale = scale.reshape(Cout, 1).astype(jnp.float32)
    shift = shift.reshape(Cout, 1).astype(jnp.float32)

    has_pool = pool_width is not None
    Mp = _round_up(M, 128)
    if has_pool:
        assert Mp == M and M % (2 * pool_width) == 0
    if Mp != M:
        a = jnp.pad(a, ((0, 0), (0, Mp - M)))
        if residual is not None:
            residual = jnp.pad(residual, ((0, 0), (0, Mp - M)))

    kb = K
    if K > KB_MAX_SINGLE:                          # rare: stream the contraction
        kb = KB_CHUNK
        Kp = _round_up(K, kb)
        if Kp != K:
            a = jnp.pad(a, ((0, Kp - K), (0, 0)))
            w = jnp.pad(w, ((0, 0), (0, Kp - K)))
            if pre_scale is not None:
                pre_scale = jnp.pad(pre_scale, (0, Kp - K))
                pre_shift = jnp.pad(pre_shift, (0, Kp - K))
            K = Kp
    nk = K // kb
    multi_k = nk > 1

    tm = _choose_tm(Mp, pool_w=pool_width, two_tc=two_tc, k_rows=K,
                    vmem_limit=vmem_limit)
    tn_out = tm // 4 if has_pool else tm
    Mout = Mp // 4 if has_pool else Mp

    def spec(shape, bmap):
        if multi_k:
            return pl.BlockSpec(shape, bmap)
        return pl.BlockSpec(shape, lambda i, _m=bmap: _m(i, 0))

    args = [w, a, scale, shift]
    in_specs = [
        spec((Cout, kb), lambda i, k: (0, k)),
        spec((kb, tm), lambda i, k: (k, i)),
        spec((Cout, 1), lambda i, k: (0, 0)),
        spec((Cout, 1), lambda i, k: (0, 0)),
    ]
    has_pre = pre_scale is not None
    if has_pre:
        assert pre_scale.shape[0] == K and pre_shift.shape[0] == K
        args += [pre_scale.reshape(K, 1).astype(jnp.float32),
                 pre_shift.reshape(K, 1).astype(jnp.float32)]
        in_specs += [spec((kb, 1), lambda i, k: (k, 0)),
                     spec((kb, 1), lambda i, k: (k, 0))]
    has_res = residual is not None
    if has_res:
        assert residual.shape == (Cout, Mp)
        args.append(residual.astype(jnp.bfloat16))
        in_specs.append(spec((Cout, tm), lambda i, k: (0, i)))
    if has_pool:
        args.append(_pool_matrix(tm, pool_width))
        in_specs.append(spec((tm, tm // 4), lambda i, k: (0, 0)))

    kernel = functools.partial(_conv_kernel, relu=relu, has_pre=has_pre,
                               has_res=has_res, has_pool=has_pool, multi_k=multi_k)
    out = pl.pallas_call(
        kernel,
        out_shape=jax.ShapeDtypeStruct((Cout, Mout), out_dtype),
        grid=(Mp // tm, nk) if multi_k else (Mp // tm,),
        in_specs=in_specs,
        out_specs=spec((Cout, tn_out), lambda i, k: (0, i)),
        scratch_shapes=[pltpu.VMEM((Cout, tm), jnp.float32)] if multi_k else [],
        compiler_params=pltpu.CompilerParams(
            dimension_semantics=("parallel", "arbitrary") if multi_k else ("parallel",),
            vmem_limit_bytes=vmem_limit),
    )(*args)
    if not has_pool and Mp != M:
        out = out[:, :M]
    return out


# --------------------------------------------------------------------------
# Channel-major im2col glue (plain JAX): SAME padding, stride 1.  K is only
# sublane-aligned (16), never 128-padded.
# --------------------------------------------------------------------------
def _im2col_t_2d(x, k, p):
    C, B, H, W = x.shape
    xp = jnp.pad(x, ((0, 0), (0, 0), (p, p), (p, p)))
    M = B * H * W
    taps = [xp[:, :, i:i + H, j:j + W].reshape(C, M)
            for i in range(k) for j in range(k)]
    K = k * k * C
    Kp = _round_up(K, K_SUBLANE_ALIGN)
    if Kp != K:
        taps.append(jnp.zeros((Kp - K, M), x.dtype))
    return jnp.concatenate(taps, axis=0)


def _im2col_t_3d(x, k, p):
    C, B, D, H, W = x.shape
    xp = jnp.pad(x, ((0, 0), (0, 0), (p, p), (p, p), (p, p)))
    M = B * D * H * W
    taps = [xp[:, :, a:a + D, i:i + H, j:j + W].reshape(C, M)
            for a in range(k) for i in range(k) for j in range(k)]
    K = k * k * k * C
    Kp = _round_up(K, K_SUBLANE_ALIGN)
    if Kp != K:
        taps.append(jnp.zeros((Kp - K, M), x.dtype))
    return jnp.concatenate(taps, axis=0)


def _avgpool_cm_fallback(y, B, H, W):
    # Plain-JAX fallback, used only when the fused-pool alignment preconditions
    # fail (never at these shapes).
    C = y.shape[0]
    Ho, Wo = H // 2, W // 2
    t = y.reshape(C, B, H, W)[:, :, :Ho * 2, :Wo * 2].astype(jnp.float32)
    t = t.reshape(C, B, Ho, 2, Wo, 2).mean(axis=(3, 5))
    return t.reshape(C, B * Ho * Wo).astype(y.dtype)


# --------------------------------------------------------------------------
# Parameters (deterministic, synthetic).  Conv2d weights (kh, kw, Cin, Cout);
# Conv3d weights (kd, kh, kw, Cin, Cout).
# --------------------------------------------------------------------------
def init_params(key, *, depth, num_channels, block_expansion,
                res_block_features, num_down_blocks, num_res_blocks):
    assert res_block_features * depth == block_expansion * 2 ** (num_down_blocks + 1)
    keys = iter(jax.random.split(key, 128))

    def conv2d_p(cin, cout, k):
        return {"w": 0.05 * jax.random.normal(next(keys), (k, k, cin, cout), jnp.float32),
                "b": 0.05 * jax.random.normal(next(keys), (cout,), jnp.float32)}

    def bn_p(c, suffix=""):
        return {"gamma" + suffix: 1.0 + 0.1 * jax.random.normal(next(keys), (c,), jnp.float32),
                "beta" + suffix: 0.1 * jax.random.normal(next(keys), (c,), jnp.float32),
                "mean" + suffix: 0.1 * jax.random.normal(next(keys), (c,), jnp.float32),
                "var" + suffix: 0.5 + jax.random.uniform(next(keys), (c,), jnp.float32)}

    params = {}
    first = conv2d_p(num_channels, block_expansion, 7)
    first.update(bn_p(block_expansion))
    params["first"] = first

    dbs = []
    for i in range(num_down_blocks):
        cin = block_expansion * 2 ** i
        cout = block_expansion * 2 ** (i + 1)
        d = conv2d_p(cin, cout, 3)
        d.update(bn_p(cout))
        dbs.append(d)
    params["down_blocks"] = dbs

    cin = block_expansion * 2 ** num_down_blocks
    cout = block_expansion * 2 ** (num_down_blocks + 1)
    params["conv"] = conv2d_p(cin, cout, 1)

    rbs = []
    Fch = res_block_features
    for _ in range(num_res_blocks):
        r = {}
        r.update(bn_p(Fch, "1"))
        r.update(bn_p(Fch, "2"))
        r["w1"] = 0.05 * jax.random.normal(next(keys), (3, 3, 3, Fch, Fch), jnp.float32)
        r["b1"] = 0.05 * jax.random.normal(next(keys), (Fch,), jnp.float32)
        r["w2"] = 0.05 * jax.random.normal(next(keys), (3, 3, 3, Fch, Fch), jnp.float32)
        r["b2"] = 0.05 * jax.random.normal(next(keys), (Fch,), jnp.float32)
        rbs.append(r)
    params["res_blocks"] = rbs
    return params


def _fold_bn(bias, gamma, beta, mean, var):
    scale = gamma * jax.lax.rsqrt(var + EPS)
    shift = (bias - mean) * scale + beta
    return scale, shift


def _pack_weight_t(w, *, pad_k=True):
    """(..., Cin, Cout) conv weight -> (Cout, K[pad16]) bf16, tap-major K rows."""
    cout = w.shape[-1]
    wt = jnp.transpose(w.reshape(-1, cout))
    if pad_k:
        K = wt.shape[1]
        Kp = _round_up(K, K_SUBLANE_ALIGN)
        if Kp != K:
            wt = jnp.pad(wt, ((0, 0), (0, Kp - K)))
    return wt.astype(jnp.bfloat16)


def prepare_params(raw):
    """Fold eval-mode BatchNorm into scale/shift and pack/transpose weights (once)."""
    p = {}

    f = raw["first"]
    s, t = _fold_bn(f["b"], f["gamma"], f["beta"], f["mean"], f["var"])
    p["first"] = {"w": _pack_weight_t(f["w"]), "scale": s, "shift": t}

    p["down_blocks"] = []
    for db in raw["down_blocks"]:
        s, t = _fold_bn(db["b"], db["gamma"], db["beta"], db["mean"], db["var"])
        p["down_blocks"].append({"w": _pack_weight_t(db["w"]), "scale": s, "shift": t})

    cv = raw["conv"]
    p["conv"] = {"w": _pack_weight_t(cv["w"], pad_k=False),
                 "scale": jnp.ones_like(cv["b"]), "shift": cv["b"]}

    p["res_blocks"] = []
    for rb in raw["res_blocks"]:
        Fch = rb["b1"].shape[0]
        K3 = 27 * Fch
        Kp = _round_up(K3, K_SUBLANE_ALIGN)
        s1 = rb["gamma1"] * jax.lax.rsqrt(rb["var1"] + EPS)
        t1 = rb["beta1"] - rb["mean1"] * s1
        pre_s = jnp.pad(jnp.tile(s1, 27), (0, Kp - K3))
        pre_t = jnp.pad(jnp.tile(t1, 27), (0, Kp - K3))
        s_c1, t_c1 = _fold_bn(rb["b1"], rb["gamma2"], rb["beta2"],
                              rb["mean2"], rb["var2"])
        p["res_blocks"].append({
            "pre_s": pre_s, "pre_t": pre_t,
            "w1": _pack_weight_t(rb["w1"]), "scale1": s_c1, "shift1": t_c1,
            "w2": _pack_weight_t(rb["w2"]),
            "scale2": jnp.ones_like(rb["b2"]), "shift2": rb["b2"],
        })
    return p


# --------------------------------------------------------------------------
# Forward pass (channel-major activations throughout)
# --------------------------------------------------------------------------
def _res_block3d(x, rb):
    """ResBlock3d: BN -> ReLU -> Conv3d -> BN -> ReLU -> Conv3d -> + x."""
    Fch, B, D, H, W = x.shape
    M = B * D * H * W
    x2 = x.reshape(Fch, M)

    a = _im2col_t_3d(x, 3, 1)                                  # raw operand
    h = fused_conv(a, rb["w1"], rb["scale1"], rb["shift1"],    # norm1+relu (A side),
                   relu=True,                                  # conv1+b1 + norm2 + relu
                   pre_scale=rb["pre_s"], pre_shift=rb["pre_t"])
    a = _im2col_t_3d(h.reshape(Fch, B, D, H, W), 3, 1)
    h = fused_conv(a, rb["w2"], rb["scale2"], rb["shift2"],    # conv2 + b2 + residual
                   relu=False, residual=x2)
    return h.reshape(Fch, B, D, H, W)


def appearance_feature_extractor(x_nchw, params, depth):
    B, C, H, W = x_nchw.shape
    xc = jnp.transpose(x_nchw, (1, 0, 2, 3)).astype(jnp.bfloat16)   # (C, B, H, W)

    # first: Conv2d 7x7 (pad 3) + BN + ReLU -- epilogue fused into the matmul.
    f = params["first"]
    out = fused_conv(_im2col_t_2d(xc, 7, 3), f["w"], f["scale"], f["shift"],
                     relu=True)                                      # (C1, B*H*W)
    curH, curW = H, W

    # DownBlock2d: Conv2d 3x3 (pad 1) + BN + ReLU + AvgPool2d(2), all fused.
    for db in params["down_blocks"]:
        Cin = out.shape[0]
        a = _im2col_t_2d(out.reshape(Cin, B, curH, curW), 3, 1)
        M = B * curH * curW
        fuse_pool = (curH % 2 == 0 and curW % 2 == 0 and
                     M % 128 == 0 and M % (2 * curW) == 0)
        if fuse_pool:
            out = fused_conv(a, db["w"], db["scale"], db["shift"], relu=True,
                             pool_width=curW)
        else:
            y = fused_conv(a, db["w"], db["scale"], db["shift"], relu=True)
            out = _avgpool_cm_fallback(y, B, curH, curW)
        curH //= 2
        curW //= 2

    # 1x1 conv (bias only); the activation itself is the GEMM operand.
    cv = params["conv"]
    out = fused_conv(out, cv["w"], cv["scale"], cv["shift"], relu=False)
    Cout = out.shape[0]
    Fch = Cout // depth

    # PyTorch: (B, Cout, H, W).view(B, F, depth, H, W); channel c -> (c//depth, c%depth)
    out = out.reshape(Fch, depth, B, curH, curW)
    out = jnp.transpose(out, (0, 2, 1, 3, 4))                        # (F, B, D, H, W)

    for rb in params["res_blocks"]:
        out = _res_block3d(out, rb)

    # back to PyTorch order (B, F, D, H, W)
    return jnp.transpose(out, (1, 0, 2, 3, 4)).astype(jnp.float32)


# --------------------------------------------------------------------------
if __name__ == "__main__":
    cfg = dict(depth=4, num_kp=15, num_channels=3, block_expansion=8,
               res_block_features=16, num_down_blocks=2, num_res_blocks=1)

    key = jax.random.PRNGKey(0)
    pkey, xkey = jax.random.split(key)
    raw = init_params(
        pkey,
        depth=cfg["depth"],
        num_channels=cfg["num_channels"],
        block_expansion=cfg["block_expansion"],
        res_block_features=cfg["res_block_features"],
        num_down_blocks=cfg["num_down_blocks"],
        num_res_blocks=cfg["num_res_blocks"],
    )
    params = prepare_params(raw)

    x = jax.random.normal(xkey, (2, cfg["num_channels"], 16, 16), jnp.float32)
    fwd = jax.jit(appearance_feature_extractor, static_argnums=(2,))
    out = jax.block_until_ready(fwd(x, params, cfg["depth"]))

    expected = (2, cfg["res_block_features"], cfg["depth"], 4, 4)
    assert out.shape == expected, (out.shape, expected)
    assert bool(jnp.all(jnp.isfinite(out)))
    print("KERNEL_OK")
</pallas_src>

<mosaic_0001>
module attributes {stable_mosaic.version = 11 : i64} {
  func.func @_conv_kernel(%arg0: i32, %arg1: memref<8x160xbf16, #tpu.memory_space<vmem>>, %arg2: memref<160x512xbf16, #tpu.memory_space<vmem>>, %arg3: memref<8x1xf32, #tpu.memory_space<vmem>>, %arg4: memref<8x1xf32, #tpu.memory_space<vmem>>, %arg5: memref<8x512xbf16, #tpu.memory_space<vmem>>) attributes {dimension_semantics = [#tpu.dimension_semantics<parallel>], iteration_bounds = array<i64: 1>, scalar_prefetch = 0 : i64, scratch_operands = 0 : i64, tpu.core_type = #tpu.core_type<tc>, window_params = [{pipeline_mode = #tpu.pipeline_mode<synchronous>, transform_indices = @transform_0, window_bounds = array<i64: 8, 160>}, {transform_indices = @transform_1, window_bounds = array<i64: 160, 512>}, {pipeline_mode = #tpu.pipeline_mode<synchronous>, transform_indices = @transform_2, window_bounds = array<i64: 8, 1>}, {pipeline_mode = #tpu.pipeline_mode<synchronous>, transform_indices = @transform_3, window_bounds = array<i64: 8, 1>}, {transform_indices = @transform_4, window_bounds = array<i64: 8, 512>}]} {
    %c0 = arith.constant 0 : index
    %c0_0 = arith.constant 0 : index
    %0 = vector.load %arg2[%c0, %c0_0] : memref<160x512xbf16, #tpu.memory_space<vmem>>, vector<160x512xbf16>
    %c0_1 = arith.constant 0 : index
    %c0_2 = arith.constant 0 : index
    %1 = vector.load %arg1[%c0_1, %c0_2] : memref<8x160xbf16, #tpu.memory_space<vmem>>, vector<8x160xbf16>
    %cst = arith.constant dense<0.000000e+00> : vector<8x512xf32>
    %2 = tpu.matmul %1, %0, %cst {dimension_numbers = #tpu.dot_dimension_numbers<[1], [0], [0], [1], [0, 0, 1, 1], [], []>} : vector<8x160xbf16>, vector<160x512xbf16>, vector<8x512xf32> -> vector<8x512xf32>
    %c0_3 = arith.constant 0 : index
    %c0_4 = arith.constant 0 : index
    %3 = vector.load %arg3[%c0_3, %c0_4] : memref<8x1xf32, #tpu.memory_space<vmem>>, vector<8x1xf32>
    %4 = vector.broadcast %3 : vector<8x1xf32> to vector<8x512xf32>
    %5 = arith.mulf %2, %4 : vector<8x512xf32>
    %c0_5 = arith.constant 0 : index
    %c0_6 = arith.constant 0 : index
    %6 = vector.load %arg4[%c0_5, %c0_6] : memref<8x1xf32, #tpu.memory_space<vmem>>, vector<8x1xf32>
    %7 = vector.broadcast %6 : vector<8x1xf32> to vector<8x512xf32>
    %8 = arith.addf %5, %7 : vector<8x512xf32>
    %cst_7 = arith.constant 0.000000e+00 : f32
    %9 = vector.broadcast %cst_7 : f32 to vector<8x512xf32>
    %10 = arith.maximumf %8, %9 : vector<8x512xf32>
    %11 = arith.truncf %10 : vector<8x512xf32> to vector<8x512xbf16>
    %c0_8 = arith.constant 0 : index
    %c0_9 = arith.constant 0 : index
    %12 = vector.load %arg5[%c0_8, %c0_9] : memref<8x512xbf16, #tpu.memory_space<vmem>>, vector<8x512xbf16>
    tpu.vector_store %arg5[%c0_8, %c0_9], %11 {strides = array<i32>} : memref<8x512xbf16, #tpu.memory_space<vmem>>, vector<8x512xbf16>,
    return
  }
  func.func @transform_0(%arg0: i32) -> (i32, i32) {
    %c0_i32 = arith.constant 0 : i32
    %c0_i32_0 = arith.constant 0 : i32
    %c0_i32_1 = arith.constant 0 : i32
    return %c0_i32, %c0_i32_0 : i32, i32
  }
  func.func @transform_1(%arg0: i32) -> (i32, i32) {
    %c0_i32 = arith.constant 0 : i32
    %c0_i32_0 = arith.constant 0 : i32
    return %c0_i32, %arg0 : i32, i32
  }
  func.func @transform_2(%arg0: i32) -> (i32, i32) {
    %c0_i32 = arith.constant 0 : i32
    %c0_i32_0 = arith.constant 0 : i32
    %c0_i32_1 = arith.constant 0 : i32
    return %c0_i32, %c0_i32_0 : i32, i32
  }
  func.func @transform_3(%arg0: i32) -> (i32, i32) {
    %c0_i32 = arith.constant 0 : i32
    %c0_i32_0 = arith.constant 0 : i32
    %c0_i32_1 = arith.constant 0 : i32
    return %c0_i32, %c0_i32_0 : i32, i32
  }
  func.func @transform_4(%arg0: i32) -> (i32, i32) {
    %c0_i32 = arith.constant 0 : i32
    %c0_i32_0 = arith.constant 0 : i32
    return %c0_i32, %arg0 : i32, i32
  }
}

module attributes {stable_mosaic.version = 11 : i64} {
  func.func @_conv_kernel(%arg0: i32, %arg1: memref<16x80xbf16, #tpu.memory_space<vmem>>, %arg2: memref<80x512xbf16, #tpu.memory_space<vmem>>, %arg3: memref<16x1xf32, #tpu.memory_space<vmem>>, %arg4: memref<16x1xf32, #tpu.memory_space<vmem>>, %arg5: memref<512x128xf32, #tpu.memory_space<vmem>>, %arg6: memref<16x128xbf16, #tpu.memory_space<vmem>>) attributes {dimension_semantics = [#tpu.dimension_semantics<parallel>], iteration_bounds = array<i64: 1>, scalar_prefetch = 0 : i64, scratch_operands = 0 : i64, tpu.core_type = #tpu.core_type<tc>, window_params = [{pipeline_mode = #tpu.pipeline_mode<synchronous>, transform_indices = @transform_0, window_bounds = array<i64: 16, 80>}, {transform_indices = @transform_1, window_bounds = array<i64: 80, 512>}, {pipeline_mode = #tpu.pipeline_mode<synchronous>, transform_indices = @transform_2, window_bounds = array<i64: 16, 1>}, {pipeline_mode = #tpu.pipeline_mode<synchronous>, transform_indices = @transform_3, window_bounds = array<i64: 16, 1>}, {pipeline_mode = #tpu.pipeline_mode<synchronous>, transform_indices = @transform_4, window_bounds = array<i64: 512, 128>}, {transform_indices = @transform_5, window_bounds = array<i64: 16, 128>}]} {
    %c0 = arith.constant 0 : index
    %c0_0 = arith.constant 0 : index
    %0 = vector.load %arg2[%c0, %c0_0] : memref<80x512xbf16, #tpu.memory_space<vmem>>, vector<80x512xbf16>
    %c0_1 = arith.constant 0 : index
    %c0_2 = arith.constant 0 : index
    %1 = vector.load %arg1[%c0_1, %c0_2] : memref<16x80xbf16, #tpu.memory_space<vmem>>, vector<16x80xbf16>
    %cst = arith.constant dense<0.000000e+00> : vector<16x512xf32>
    %2 = tpu.matmul %1, %0, %cst {dimension_numbers = #tpu.dot_dimension_numbers<[1], [0], [0], [1], [0, 0, 1, 1], [], []>} : vector<16x80xbf16>, vector<80x512xbf16>, vector<16x512xf32> -> vector<16x512xf32>
    %c0_3 = arith.constant 0 : index
    %c0_4 = arith.constant 0 : index
    %3 = vector.load %arg3[%c0_3, %c0_4] : memref<16x1xf32, #tpu.memory_space<vmem>>, vector<16x1xf32>
    %4 = vector.broadcast %3 : vector<16x1xf32> to vector<16x512xf32>
    %5 = arith.mulf %2, %4 : vector<16x512xf32>
    %c0_5 = arith.constant 0 : index
    %c0_6 = arith.constant 0 : index
    %6 = vector.load %arg4[%c0_5, %c0_6] : memref<16x1xf32, #tpu.memory_space<vmem>>, vector<16x1xf32>
    %7 = vector.broadcast %6 : vector<16x1xf32> to vector<16x512xf32>
    %8 = arith.addf %5, %7 : vector<16x512xf32>
    %cst_7 = arith.constant 0.000000e+00 : f32
    %9 = vector.broadcast %cst_7 : f32 to vector<16x512xf32>
    %10 = arith.maximumf %8, %9 : vector<16x512xf32>
    %c0_8 = arith.constant 0 : index
    %c0_9 = arith.constant 0 : index
    %11 = vector.load %arg5[%c0_8, %c0_9] : memref<512x128xf32, #tpu.memory_space<vmem>>, vector<512x128xf32>
    %cst_10 = arith.constant dense<0.000000e+00> : vector<16x128xf32>
    %12 = tpu.matmul %10, %11, %cst_10 {dimension_numbers = #tpu.dot_dimension_numbers<[1], [0], [0], [1], [0, 0, 1, 1], [], []>} : vector<16x512xf32>, vector<512x128xf32>, vector<16x128xf32> -> vector<16x128xf32>
    %13 = arith.truncf %12 : vector<16x128xf32> to vector<16x128xbf16>
    %c0_11 = arith.constant 0 : index
    %c0_12 = arith.constant 0 : index
    %14 = vector.load %arg6[%c0_11, %c0_12] : memref<16x128xbf16, #tpu.memory_space<vmem>>, vector<16x128xbf16>
    tpu.vector_store %arg6[%c0_11, %c0_12], %13 {strides = array<i32>} : memref<16x128xbf16, #tpu.memory_space<vmem>>, vector<16x128xbf16>,
    return
  }
  func.func @transform_0(%arg0: i32) -> (i32, i32) {
    %c0_i32 = arith.constant 0 : i32
    %c0_i32_0 = arith.constant 0 : i32
    %c0_i32_1 = arith.constant 0 : i32
    return %c0_i32, %c0_i32_0 : i32, i32
  }
  func.func @transform_1(%arg0: i32) -> (i32, i32) {
    %c0_i32 = arith.constant 0 : i32
    %c0_i32_0 = arith.constant 0 : i32
    return %c0_i32, %arg0 : i32, i32
  }
  func.func @transform_2(%arg0: i32) -> (i32, i32) {
    %c0_i32 = arith.constant 0 : i32
    %c0_i32_0 = arith.constant 0 : i32
    %c0_i32_1 = arith.constant 0 : i32
    return %c0_i32, %c0_i32_0 : i32, i32
  }
  func.func @transform_3(%arg0: i32) -> (i32, i32) {
    %c0_i32 = arith.constant 0 : i32
    %c0_i32_0 = arith.constant 0 : i32
    %c0_i32_1 = arith.constant 0 : i32
    return %c0_i32, %c0_i32_0 : i32, i32
  }
  func.func @transform_4(%arg0: i32) -> (i32, i32) {
    %c0_i32 = arith.constant 0 : i32
    %c0_i32_0 = arith.constant 0 : i32
    %c0_i32_1 = arith.constant 0 : i32
    return %c0_i32, %c0_i32_0 : i32, i32
  }
  func.func @transform_5(%arg0: i32) -> (i32, i32) {
    %c0_i32 = arith.constant 0 : i32
    %c0_i32_0 = arith.constant 0 : i32
    return %c0_i32, %arg0 : i32, i32
  }
}

module attributes {stable_mosaic.version = 11 : i64} {
  func.func @_conv_kernel(%arg0: i32, %arg1: memref<32x144xbf16, #tpu.memory_space<vmem>>, %arg2: memref<144x128xbf16, #tpu.memory_space<vmem>>, %arg3: memref<32x1xf32, #tpu.memory_space<vmem>>, %arg4: memref<32x1xf32, #tpu.memory_space<vmem>>, %arg5: memref<128x32xf32, #tpu.memory_space<vmem>>, %arg6: memref<32x32xbf16, #tpu.memory_space<vmem>>) attributes {dimension_semantics = [#tpu.dimension_semantics<parallel>], iteration_bounds = array<i64: 1>, scalar_prefetch = 0 : i64, scratch_operands = 0 : i64, tpu.core_type = #tpu.core_type<tc>, window_params = [{pipeline_mode = #tpu.pipeline_mode<synchronous>, transform_indices = @transform_0, window_bounds = array<i64: 32, 144>}, {transform_indices = @transform_1, window_bounds = array<i64: 144, 128>}, {pipeline_mode = #tpu.pipeline_mode<synchronous>, transform_indices = @transform_2, window_bounds = array<i64: 32, 1>}, {pipeline_mode = #tpu.pipeline_mode<synchronous>, transform_indices = @transform_3, window_bounds = array<i64: 32, 1>}, {pipeline_mode = #tpu.pipeline_mode<synchronous>, transform_indices = @transform_4, window_bounds = array<i64: 128, 32>}, {transform_indices = @transform_5, window_bounds = array<i64: 32, 32>}]} {
    %c0 = arith.constant 0 : index
    %c0_0 = arith.constant 0 : index
    %0 = vector.load %arg2[%c0, %c0_0] : memref<144x128xbf16, #tpu.memory_space<vmem>>, vector<144x128xbf16>
    %c0_1 = arith.constant 0 : index
    %c0_2 = arith.constant 0 : index
    %1 = vector.load %arg1[%c0_1, %c0_2] : memref<32x144xbf16, #tpu.memory_space<vmem>>, vector<32x144xbf16>
    %cst = arith.constant dense<0.000000e+00> : vector<32x128xf32>
    %2 = tpu.matmul %1, %0, %cst {dimension_numbers = #tpu.dot_dimension_numbers<[1], [0], [0], [1], [0, 0, 1, 1], [], []>} : vector<32x144xbf16>, vector<144x128xbf16>, vector<32x128xf32> -> vector<32x128xf32>
    %c0_3 = arith.constant 0 : index
    %c0_4 = arith.constant 0 : index
    %3 = vector.load %arg3[%c0_3, %c0_4] : memref<32x1xf32, #tpu.memory_space<vmem>>, vector<32x1xf32>
    %4 = vector.broadcast %3 : vector<32x1xf32> to vector<32x128xf32>
    %5 = arith.mulf %2, %4 : vector<32x128xf32>
    %c0_5 = arith.constant 0 : index
    %c0_6 = arith.constant 0 : index
    %6 = vector.load %arg4[%c0_5, %c0_6] : memref<32x1xf32, #tpu.memory_space<vmem>>, vector<32x1xf32>
    %7 = vector.broadcast %6 : vector<32x1xf32> to vector<32x128xf32>
    %8 = arith.addf %5, %7 : vector<32x128xf32>
    %cst_7 = arith.constant 0.000000e+00 : f32
    %9 = vector.broadcast %cst_7 : f32 to vector<32x128xf32>
    %10 = arith.maximumf %8, %9 : vector<32x128xf32>
    %c0_8 = arith.constant 0 : index
    %c0_9 = arith.constant 0 : index
    %11 = vector.load %arg5[%c0_8, %c0_9] : memref<128x32xf32, #tpu.memory_space<vmem>>, vector<128x32xf32>
    %cst_10 = arith.constant dense<0.000000e+00> : vector<32x32xf32>
    %12 = tpu.matmul %10, %11, %cst_10 {dimension_numbers = #tpu.dot_dimension_numbers<[1], [0], [0], [1], [0, 0, 1, 1], [], []>} : vector<32x128xf32>, vector<128x32xf32>, vector<32x32xf32> -> vector<32x32xf32>
    %13 = arith.truncf %12 : vector<32x32xf32> to vector<32x32xbf16>
    %c0_11 = arith.constant 0 : index
    %c0_12 = arith.constant 0 : index
    %14 = vector.load %arg6[%c0_11, %c0_12] : memref<32x32xbf16, #tpu.memory_space<vmem>>, vector<32x32xbf16>
    tpu.vector_store %arg6[%c0_11, %c0_12], %13 {strides = array<i32>} : memref<32x32xbf16, #tpu.memory_space<vmem>>, vector<32x32xbf16>,
    return
  }
  func.func @transform_0(%arg0: i32) -> (i32, i32) {
    %c0_i32 = arith.constant 0 : i32
    %c0_i32_0 = arith.constant 0 : i32
    %c0_i32_1 = arith.constant 0 : i32
    return %c0_i32, %c0_i32_0 : i32, i32
  }
  func.func @transform_1(%arg0: i32) -> (i32, i32) {
    %c0_i32 = arith.constant 0 : i32
    %c0_i32_0 = arith.constant 0 : i32
    return %c0_i32, %arg0 : i32, i32
  }
  func.func @transform_2(%arg0: i32) -> (i32, i32) {
    %c0_i32 = arith.constant 0 : i32
    %c0_i32_0 = arith.constant 0 : i32
    %c0_i32_1 = arith.constant 0 : i32
    return %c0_i32, %c0_i32_0 : i32, i32
  }
  func.func @transform_3(%arg0: i32) -> (i32, i32) {
    %c0_i32 = arith.constant 0 : i32
    %c0_i32_0 = arith.constant 0 : i32
    %c0_i32_1 = arith.constant 0 : i32
    return %c0_i32, %c0_i32_0 : i32, i32
  }
  func.func @transform_4(%arg0: i32) -> (i32, i32) {
    %c0_i32 = arith.constant 0 : i32
    %c0_i32_0 = arith.constant 0 : i32
    %c0_i32_1 = arith.constant 0 : i32
    return %c0_i32, %c0_i32_0 : i32, i32
  }
  func.func @transform_5(%arg0: i32) -> (i32, i32) {
    %c0_i32 = arith.constant 0 : i32
    %c0_i32_0 = arith.constant 0 : i32
    return %c0_i32, %arg0 : i32, i32
  }
}

module attributes {stable_mosaic.version = 11 : i64} {
  func.func @_conv_kernel(%arg0: i32, %arg1: memref<64x32xbf16, #tpu.memory_space<vmem>>, %arg2: memref<32x128xbf16, #tpu.memory_space<vmem>>, %arg3: memref<64x1xf32, #tpu.memory_space<vmem>>, %arg4: memref<64x1xf32, #tpu.memory_space<vmem>>, %arg5: memref<64x128xbf16, #tpu.memory_space<vmem>>) attributes {dimension_semantics = [#tpu.dimension_semantics<parallel>], iteration_bounds = array<i64: 1>, scalar_prefetch = 0 : i64, scratch_operands = 0 : i64, tpu.core_type = #tpu.core_type<tc>, window_params = [{pipeline_mode = #tpu.pipeline_mode<synchronous>, transform_indices = @transform_0, window_bounds = array<i64: 64, 32>}, {transform_indices = @transform_1, window_bounds = array<i64: 32, 128>}, {pipeline_mode = #tpu.pipeline_mode<synchronous>, transform_indices = @transform_2, window_bounds = array<i64: 64, 1>}, {pipeline_mode = #tpu.pipeline_mode<synchronous>, transform_indices = @transform_3, window_bounds = array<i64: 64, 1>}, {transform_indices = @transform_4, window_bounds = array<i64: 64, 128>}]} {
    %c0 = arith.constant 0 : index
    %c0_0 = arith.constant 0 : index
    %0 = vector.load %arg2[%c0, %c0_0] : memref<32x128xbf16, #tpu.memory_space<vmem>>, vector<32x128xbf16>
    %c0_1 = arith.constant 0 : index
    %c0_2 = arith.constant 0 : index
    %1 = vector.load %arg1[%c0_1, %c0_2] : memref<64x32xbf16, #tpu.memory_space<vmem>>, vector<64x32xbf16>
    %cst = arith.constant dense<0.000000e+00> : vector<64x128xf32>
    %2 = tpu.matmul %1, %0, %cst {dimension_numbers = #tpu.dot_dimension_numbers<[1], [0], [0], [1], [0, 0, 1, 1], [], []>} : vector<64x32xbf16>, vector<32x128xbf16>, vector<64x128xf32> -> vector<64x128xf32>
    %c0_3 = arith.constant 0 : index
    %c0_4 = arith.constant 0 : index
    %3 = vector.load %arg3[%c0_3, %c0_4] : memref<64x1xf32, #tpu.memory_space<vmem>>, vector<64x1xf32>
    %4 = vector.broadcast %3 : vector<64x1xf32> to vector<64x128xf32>
    %5 = arith.mulf %2, %4 : vector<64x128xf32>
    %c0_5 = arith.constant 0 : index
    %c0_6 = arith.constant 0 : index
    %6 = vector.load %arg4[%c0_5, %c0_6] : memref<64x1xf32, #tpu.memory_space<vmem>>, vector<64x1xf32>
    %7 = vector.broadcast %6 : vector<64x1xf32> to vector<64x128xf32>
    %8 = arith.addf %5, %7 : vector<64x128xf32>
    %9 = arith.truncf %8 : vector<64x128xf32> to vector<64x128xbf16>
    %c0_7 = arith.constant 0 : index
    %c0_8 = arith.constant 0 : index
    %10 = vector.load %arg5[%c0_7, %c0_8] : memref<64x128xbf16, #tpu.memory_space<vmem>>, vector<64x128xbf16>
    tpu.vector_store %arg5[%c0_7, %c0_8], %9 {strides = array<i32>} : memref<64x128xbf16, #tpu.memory_space<vmem>>, vector<64x128xbf16>,
    return
  }
  func.func @transform_0(%arg0: i32) -> (i32, i32) {
    %c0_i32 = arith.constant 0 : i32
    %c0_i32_0 = arith.constant 0 : i32
    %c0_i32_1 = arith.constant 0 : i32
    return %c0_i32, %c0_i32_0 : i32, i32
  }
  func.func @transform_1(%arg0: i32) -> (i32, i32) {
    %c0_i32 = arith.constant 0 : i32
    %c0_i32_0 = arith.constant 0 : i32
    return %c0_i32, %arg0 : i32, i32
  }
  func.func @transform_2(%arg0: i32) -> (i32, i32) {
    %c0_i32 = arith.constant 0 : i32
    %c0_i32_0 = arith.constant 0 : i32
    %c0_i32_1 = arith.constant 0 : i32
    return %c0_i32, %c0_i32_0 : i32, i32
  }
  func.func @transform_3(%arg0: i32) -> (i32, i32) {
    %c0_i32 = arith.constant 0 : i32
    %c0_i32_0 = arith.constant 0 : i32
    %c0_i32_1 = arith.constant 0 : i32
    return %c0_i32, %c0_i32_0 : i32, i32
  }
  func.func @transform_4(%arg0: i32) -> (i32, i32) {
    %c0_i32 = arith.constant 0 : i32
    %c0_i32_0 = arith.constant 0 : i32
    return %c0_i32, %arg0 : i32, i32
  }
}

module attributes {stable_mosaic.version = 11 : i64} {
  func.func @_conv_kernel(%arg0: i32, %arg1: memref<16x432xbf16, #tpu.memory_space<vmem>>, %arg2: memref<432x128xbf16, #tpu.memory_space<vmem>>, %arg3: memref<16x1xf32, #tpu.memory_space<vmem>>, %arg4: memref<16x1xf32, #tpu.memory_space<vmem>>, %arg5: memref<432x1xf32, #tpu.memory_space<vmem>>, %arg6: memref<432x1xf32, #tpu.memory_space<vmem>>, %arg7: memref<16x128xbf16, #tpu.memory_space<vmem>>) attributes {dimension_semantics = [#tpu.dimension_semantics<parallel>], iteration_bounds = array<i64: 1>, scalar_prefetch = 0 : i64, scratch_operands = 0 : i64, tpu.core_type = #tpu.core_type<tc>, window_params = [{pipeline_mode = #tpu.pipeline_mode<synchronous>, transform_indices = @transform_0, window_bounds = array<i64: 16, 432>}, {transform_indices = @transform_1, window_bounds = array<i64: 432, 128>}, {pipeline_mode = #tpu.pipeline_mode<synchronous>, transform_indices = @transform_2, window_bounds = array<i64: 16, 1>}, {pipeline_mode = #tpu.pipeline_mode<synchronous>, transform_indices = @transform_3, window_bounds = array<i64: 16, 1>}, {pipeline_mode = #tpu.pipeline_mode<synchronous>, transform_indices = @transform_4, window_bounds = array<i64: 432, 1>}, {pipeline_mode = #tpu.pipeline_mode<synchronous>, transform_indices = @transform_5, window_bounds = array<i64: 432, 1>}, {transform_indices = @transform_6, window_bounds = array<i64: 16, 128>}]} {
    %c0 = arith.constant 0 : index
    %c0_0 = arith.constant 0 : index
    %0 = vector.load %arg2[%c0, %c0_0] : memref<432x128xbf16, #tpu.memory_space<vmem>>, vector<432x128xbf16>
    %1 = arith.extf %0 : vector<432x128xbf16> to vector<432x128xf32>
    %c0_1 = arith.constant 0 : index
    %c0_2 = arith.constant 0 : index
    %2 = vector.load %arg5[%c0_1, %c0_2] : memref<432x1xf32, #tpu.memory_space<vmem>>, vector<432x1xf32>
    %3 = vector.broadcast %2 : vector<432x1xf32> to vector<432x128xf32>
    %4 = arith.mulf %1, %3 : vector<432x128xf32>
    %c0_3 = arith.constant 0 : index
    %c0_4 = arith.constant 0 : index
    %5 = vector.load %arg6[%c0_3, %c0_4] : memref<432x1xf32, #tpu.memory_space<vmem>>, vector<432x1xf32>
    %6 = vector.broadcast %5 : vector<432x1xf32> to vector<432x128xf32>
    %7 = arith.addf %4, %6 : vector<432x128xf32>
    %cst = arith.constant 0.000000e+00 : f32
    %8 = vector.broadcast %cst : f32 to vector<432x128xf32>
    %9 = arith.maximumf %7, %8 : vector<432x128xf32>
    %10 = arith.truncf %9 : vector<432x128xf32> to vector<432x128xbf16>
    %c0_5 = arith.constant 0 : index
    %c0_6 = arith.constant 0 : index
    %11 = vector.load %arg1[%c0_5, %c0_6] : memref<16x432xbf16, #tpu.memory_space<vmem>>, vector<16x432xbf16>
    %cst_7 = arith.constant dense<0.000000e+00> : vector<16x128xf32>
    %12 = tpu.matmul %11, %10, %cst_7 {dimension_numbers = #tpu.dot_dimension_numbers<[1], [0], [0], [1], [0, 0, 1, 1], [], []>} : vector<16x432xbf16>, vector<432x128xbf16>, vector<16x128xf32> -> vector<16x128xf32>
    %c0_8 = arith.constant 0 : index
    %c0_9 = arith.constant 0 : index
    %13 = vector.load %arg3[%c0_8, %c0_9] : memref<16x1xf32, #tpu.memory_space<vmem>>, vector<16x1xf32>
    %14 = vector.broadcast %13 : vector<16x1xf32> to vector<16x128xf32>
    %15 = arith.mulf %12, %14 : vector<16x128xf32>
    %c0_10 = arith.constant 0 : index
    %c0_11 = arith.constant 0 : index
    %16 = vector.load %arg4[%c0_10, %c0_11] : memref<16x1xf32, #tpu.memory_space<vmem>>, vector<16x1xf32>
    %17 = vector.broadcast %16 : vector<16x1xf32> to vector<16x128xf32>
    %18 = arith.addf %15, %17 : vector<16x128xf32>
    %cst_12 = arith.constant 0.000000e+00 : f32
    %19 = vector.broadcast %cst_12 : f32 to vector<16x128xf32>
    %20 = arith.maximumf %18, %19 : vector<16x128xf32>
    %21 = arith.truncf %20 : vector<16x128xf32> to vector<16x128xbf16>
    %c0_13 = arith.constant 0 : index
    %c0_14 = arith.constant 0 : index
    %22 = vector.load %arg7[%c0_13, %c0_14] : memref<16x128xbf16, #tpu.memory_space<vmem>>, vector<16x128xbf16>
    tpu.vector_store %arg7[%c0_13, %c0_14], %21 {strides = array<i32>} : memref<16x128xbf16, #tpu.memory_space<vmem>>, vector<16x128xbf16>,
    return
  }
  func.func @transform_0(%arg0: i32) -> (i32, i32) {
    %c0_i32 = arith.constant 0 : i32
    %c0_i32_0 = arith.constant 0 : i32
    %c0_i32_1 = arith.constant 0 : i32
    return %c0_i32, %c0_i32_0 : i32, i32
  }
  func.func @transform_1(%arg0: i32) -> (i32, i32) {
    %c0_i32 = arith.constant 0 : i32
    %c0_i32_0 = arith.constant 0 : i32
    return %c0_i32, %arg0 : i32, i32
  }
  func.func @transform_2(%arg0: i32) -> (i32, i32) {
    %c0_i32 = arith.constant 0 : i32
    %c0_i32_0 = arith.constant 0 : i32
    %c0_i32_1 = arith.constant 0 : i32
    return %c0_i32, %c0_i32_0 : i32, i32
  }
  func.func @transform_3(%arg0: i32) -> (i32, i32) {
    %c0_i32 = arith.constant 0 : i32
    %c0_i32_0 = arith.constant 0 : i32
    %c0_i32_1 = arith.constant 0 : i32
    return %c0_i32, %c0_i32_0 : i32, i32
  }
  func.func @transform_4(%arg0: i32) -> (i32, i32) {
    %c0_i32 = arith.constant 0 : i32
    %c0_i32_0 = arith.constant 0 : i32
    %c0_i32_1 = arith.constant 0 : i32
    return %c0_i32, %c0_i32_0 : i32, i32
  }
  func.func @transform_5(%arg0: i32) -> (i32, i32) {
    %c0_i32 = arith.constant 0 : i32
    %c0_i32_0 = arith.constant 0 : i32
    %c0_i32_1 = arith.constant 0 : i32
    return %c0_i32, %c0_i32_0 : i32, i32
  }
  func.func @transform_6(%arg0: i32) -> (i32, i32) {
    %c0_i32 = arith.constant 0 : i32
    %c0_i32_0 = arith.constant 0 : i32
    return %c0_i32, %arg0 : i32, i32
  }
}

module attributes {stable_mosaic.version = 11 : i64} {
  func.func @_conv_kernel(%arg0: i32, %arg1: memref<16x432xbf16, #tpu.memory_space<vmem>>, %arg2: memref<432x128xbf16, #tpu.memory_space<vmem>>, %arg3: memref<16x1xf32, #tpu.memory_space<vmem>>, %arg4: memref<16x1xf32, #tpu.memory_space<vmem>>, %arg5: memref<16x128xbf16, #tpu.memory_space<vmem>>, %arg6: memref<16x128xbf16, #tpu.memory_space<vmem>>) attributes {dimension_semantics = [#tpu.dimension_semantics<parallel>], iteration_bounds = array<i64: 1>, scalar_prefetch = 0 : i64, scratch_operands = 0 : i64, tpu.core_type = #tpu.core_type<tc>, window_params = [{pipeline_mode = #tpu.pipeline_mode<synchronous>, transform_indices = @transform_0, window_bounds = array<i64: 16, 432>}, {transform_indices = @transform_1, window_bounds = array<i64: 432, 128>}, {pipeline_mode = #tpu.pipeline_mode<synchronous>, transform_indices = @transform_2, window_bounds = array<i64: 16, 1>}, {pipeline_mode = #tpu.pipeline_mode<synchronous>, transform_indices = @transform_3, window_bounds = array<i64: 16, 1>}, {transform_indices = @transform_4, window_bounds = array<i64: 16, 128>}, {transform_indices = @transform_5, window_bounds = array<i64: 16, 128>}]} {
    %c0 = arith.constant 0 : index
    %c0_0 = arith.constant 0 : index
    %0 = vector.load %arg2[%c0, %c0_0] : memref<432x128xbf16, #tpu.memory_space<vmem>>, vector<432x128xbf16>
    %c0_1 = arith.constant 0 : index
    %c0_2 = arith.constant 0 : index
    %1 = vector.load %arg1[%c0_1, %c0_2] : memref<16x432xbf16, #tpu.memory_space<vmem>>, vector<16x432xbf16>
    %cst = arith.constant dense<0.000000e+00> : vector<16x128xf32>
    %2 = tpu.matmul %1, %0, %cst {dimension_numbers = #tpu.dot_dimension_numbers<[1], [0], [0], [1], [0, 0, 1, 1], [], []>} : vector<16x432xbf16>, vector<432x128xbf16>, vector<16x128xf32> -> vector<16x128xf32>
    %c0_3 = arith.constant 0 : index
    %c0_4 = arith.constant 0 : index
    %3 = vector.load %arg3[%c0_3, %c0_4] : memref<16x1xf32, #tpu.memory_space<vmem>>, vector<16x1xf32>
    %4 = vector.broadcast %3 : vector<16x1xf32> to vector<16x128xf32>
    %5 = arith.mulf %2, %4 : vector<16x128xf32>
    %c0_5 = arith.constant 0 : index
    %c0_6 = arith.constant 0 : index
    %6 = vector.load %arg4[%c0_5, %c0_6] : memref<16x1xf32, #tpu.memory_space<vmem>>, vector<16x1xf32>
    %7 = vector.broadcast %6 : vector<16x1xf32> to vector<16x128xf32>
    %8 = arith.addf %5, %7 : vector<16x128xf32>
    %c0_7 = arith.constant 0 : index
    %c0_8 = arith.constant 0 : index
    %9 = vector.load %arg5[%c0_7, %c0_8] : memref<16x128xbf16, #tpu.memory_space<vmem>>, vector<16x128xbf16>
    %10 = arith.extf %9 : vector<16x128xbf16> to vector<16x128xf32>
    %11 = arith.addf %8, %10 : vector<16x128xf32>
    %12 = arith.truncf %11 : vector<16x128xf32> to vector<16x128xbf16>
    %c0_9 = arith.constant 0 : index
    %c0_10 = arith.constant 0 : index
    %13 = vector.load %arg6[%c0_9, %c0_10] : memref<16x128xbf16, #tpu.memory_space<vmem>>, vector<16x128xbf16>
    tpu.vector_store %arg6[%c0_9, %c0_10], %12 {strides = array<i32>} : memref<16x128xbf16, #tpu.memory_space<vmem>>, vector<16x128xbf16>,
    return
  }
  func.func @transform_0(%arg0: i32) -> (i32, i32) {
    %c0_i32 = arith.constant 0 : i32
    %c0_i32_0 = arith.constant 0 : i32
    %c0_i32_1 = arith.constant 0 : i32
    return %c0_i32, %c0_i32_0 : i32, i32
  }
  func.func @transform_1(%arg0: i32) -> (i32, i32) {
    %c0_i32 = arith.constant 0 : i32
    %c0_i32_0 = arith.constant 0 : i32
    return %c0_i32, %arg0 : i32, i32
  }
  func.func @transform_2(%arg0: i32) -> (i32, i32) {
    %c0_i32 = arith.constant 0 : i32
    %c0_i32_0 = arith.constant 0 : i32
    %c0_i32_1 = arith.constant 0 : i32
    return %c0_i32, %c0_i32_0 : i32, i32
  }
  func.func @transform_3(%arg0: i32) -> (i32, i32) {
    %c0_i32 = arith.constant 0 : i32
    %c0_i32_0 = arith.constant 0 : i32
    %c0_i32_1 = arith.constant 0 : i32
    return %c0_i32, %c0_i32_0 : i32, i32
  }
  func.func @transform_4(%arg0: i32) -> (i32, i32) {
    %c0_i32 = arith.constant 0 : i32
    %c0_i32_0 = arith.constant 0 : i32
    return %c0_i32, %arg0 : i32, i32
  }
  func.func @transform_5(%arg0: i32) -> (i32, i32) {
    %c0_i32 = arith.constant 0 : i32
    %c0_i32_0 = arith.constant 0 : i32
    return %c0_i32, %arg0 : i32, i32
  }
}

</mosaic_0001>

<bundles_post_ra>
// kernel: appearance_feature_extractor.6
= control target key start
LH: loop header
LB: loop body
LE: loop exit
PB: predicated region body
PF: predicated region fallthrough
CT: control target
= control target key end

     0   :  { %vm265_vm0 = vcmask 261120   ;;  %s906_s1 = inlined_call_operand.vmem [shape: bf16[160,512], index: 1, kind: input, shape index: {}]   ;;  %s907_s0 = inlined_call_operand.vmem [shape: bf16[8,160], index: 0, kind: input, shape index: {}]   ;;  %s908_s2 = inlined_call_operand.vmem [shape: f32[8,1], index: 2, kind: input, shape index: {}]   ;;  %s909_s3 = inlined_call_operand.vmem [shape: f32[8,1], index: 3, kind: input, shape index: {}]   ;;  %s910_s4 = inlined_call_operand.vmem [shape: bf16[8,512], index: 4, kind: output, shape index: {}]  }
   0x1   :  { %v519_v0 = vld [vmem:[%s906_s1 + $0xe0] sm:$0xf]  ;;  %v599_v1 = vld [vmem:[%s906_s1 + $0xec] sm:$0xf0]  ;;  %v597_v2 = vld [vmem:[%s906_s1 + $0xe4] sm:$0xf] }
   0x2   :  { %v520_v3 = vor.u32 %v599_v1, %v519_v0  ;;  %v521_v4 = vld [vmem:[%s906_s1 + $0xf0] sm:$0xf0]  ;;  %v551_v5 = vld [vmem:[%s906_s1 + $0x120] sm:$0xf]  ;;  %v607_v6 = vld [vmem:[%s906_s1 + $0x12c] sm:$0xf0] }
   0x3   :  { %v524_v7 = vor.u32 %v597_v2, %v521_v4  ;;  %v552_v8 = vor.u32 %v607_v6, %v551_v5  ;;  %v559_v9 = vld [vmem:[%s906_s1 + $0x128] sm:$0xf]  ;;  %v608_v10 = vld [vmem:[%s906_s1 + $0x134] sm:$0xf0]  ;;  %v503_v11 = vld [vmem:[%s906_s1 + $0xc0] sm:$0xf] }
   0x4   :  { %269 = vmatpush.bf16.msra.mxu0 %v520_v3  ;;  %v560_v12 = vor.u32 %v608_v10, %v559_v9  ;;  %v595_v13 = vld [vmem:[%s906_s1 + $0xcc] sm:$0xf0]  ;;  %v593_v14 = vld [vmem:[%s906_s1 + $0xc4] sm:$0xf]  ;;  %v505_v15 = vld [vmem:[%s906_s1 + $0xd0] sm:$0xf0] }
   0x5   :  { %295 = vmatpush.bf16.msra.mxu2 %v524_v7  ;;  %288 = vmatpush.bf16.msra.mxu1 %v552_v8  ;;  %v504_v16 = vor.u32 %v595_v13, %v503_v11  ;;  %v508_v17 = vor.u32 %v593_v14, %v505_v15  ;;  %v535_v18 = vld [vmem:[%s906_s1 + $0x100] sm:$0xf]  ;;  %v603_v19 = vld [vmem:[%s906_s1 + $0x10c] sm:$0xf0]  ;;  %v527_v20 = vld [vmem:[%s906_s1 + $0xe8] sm:$0xf] }
   0x6   :  { %340 = vmatpush.bf16.msra.mxu3 %v560_v12  ;;  %v536_v21 = vor.u32 %v603_v19, %v535_v18  ;;  %v600_v22 = vld [vmem:[%s906_s1 + $0xf4] sm:$0xf0]  ;;  %v543_v23 = vld [vmem:[%s906_s1 + $0x108] sm:$0xf]  ;;  %v487_v27 = vld [vmem:[%s906_s1 + $0xa0] sm:$0xf] }
   0x7   :  { %v604_v24 = vld [vmem:[%s906_s1 + $0x114] sm:$0xf0]  ;;  %v528_v25 = vor.u32 %v600_v22, %v527_v20  ;;  %v591_v28 = vld [vmem:[%s906_s1 + $0xac] sm:$0xf0]  ;;  %v589_v29 = vld [vmem:[%s906_s1 + $0xa4] sm:$0xf] }
   0x8   :  { %v544_v26 = vor.u32 %v604_v24, %v543_v23  ;;  %270 = vmatpush.bf16.msra.mxu0 %v504_v16  ;;  %v488_v30 = vor.u32 %v591_v28, %v487_v27  ;;  %v489_v31 = vld [vmem:[%s906_s1 + $0xb0] sm:$0xf0]  ;;  %v598_v32 = vld [vmem:[%s906_s1 + $0xec] sm:$0xf]  ;;  %v529_v33 = vld [vmem:[%s906_s1 + $0xf8] sm:$0xf0] }
   0x9   :  { %296 = vmatpush.bf16.msra.mxu2 %v508_v17  ;;  %289 = vmatpush.bf16.msra.mxu1 %v536_v21  ;;  %v492_v34 = vor.u32 %v589_v29, %v489_v31  ;;  %v532_v35 = vor.u32 %v598_v32, %v529_v33  ;;  %v511_v36 = vld [vmem:[%s906_s1 + $0xc8] sm:$0xf]  ;;  %v596_v37 = vld [vmem:[%s906_s1 + $0xd4] sm:$0xf0]  ;;  %v471_v38 = vld [vmem:[%s906_s1 + $0x80] sm:$0xf] }
   0xa   :  { %341 = vmatpush.bf16.msra.mxu3 %v544_v26  ;;  %v512_v39 = vor.u32 %v596_v37, %v511_v36  ;;  %v587_v40 = vld [vmem:[%s906_s1 + $0x8c] sm:$0xf0]  ;;  %v585_v41 = vld [vmem:[%s906_s1 + $0x84] sm:$0xf]  ;;  %v473_v42 = vld [vmem:[%s906_s1 + $0x90] sm:$0xf0] }
   0xb   :  { %v594_v43 = vld [vmem:[%s906_s1 + $0xcc] sm:$0xf]  ;;  %v513_v44 = vld [vmem:[%s906_s1 + $0xd8] sm:$0xf0]  ;;  %v495_v45 = vld [vmem:[%s906_s1 + $0xa8] sm:$0xf]  ;;  %v472_v46 = vor.u32 %v587_v40, %v471_v38  ;;  %v476_v49 = vor.u32 %v585_v41, %v473_v42 }
   0xc   :  { %271 = vmatpush.bf16.msra.mxu0 %v488_v30  ;;  %v516_v47 = vor.u32 %v594_v43, %v513_v44  ;;  %v592_v48 = vld [vmem:[%s906_s1 + $0xb4] sm:$0xf0]  ;;  %v455_v50 = vld [vmem:[%s906_s1 + $0x60] sm:$0xf]  ;;  %v583_v51 = vld [vmem:[%s906_s1 + $0x6c] sm:$0xf0] }
   0xd   :  { %321 = vmatpush.bf16.msrb.mxu1 %v528_v25  ;;  %297 = vmatpush.bf16.msra.mxu2 %v492_v34  ;;  %v590_v52 = vld [vmem:[%s906_s1 + $0xac] sm:$0xf]  ;;  %v496_v53 = vor.u32 %v592_v48, %v495_v45  ;;  %v581_v54 = vld [vmem:[%s906_s1 + $0x64] sm:$0xf]  ;;  %v457_v55 = vld [vmem:[%s906_s1 + $0x70] sm:$0xf0]  ;;  %v456_v60 = vor.u32 %v583_v51, %v455_v50 }
   0xe   :  { %347 = vmatpush.bf16.msrb.mxu3 %v532_v35  ;;  %v497_v56 = vld [vmem:[%s906_s1 + $0xb8] sm:$0xf0]  ;;  %v479_v58 = vld [vmem:[%s906_s1 + $0x88] sm:$0xf]  ;;  %v588_v59 = vld [vmem:[%s906_s1 + $0x94] sm:$0xf0]  ;;  %v460_v63 = vor.u32 %v581_v54, %v457_v55 }
   0xf   :  { %v500_v57 = vor.u32 %v590_v52, %v497_v56  ;;  %v586_v61 = vld [vmem:[%s906_s1 + $0x8c] sm:$0xf]  ;;  %v481_v62 = vld [vmem:[%s906_s1 + $0x98] sm:$0xf0]  ;;  %v439_v0 = vld [vmem:[%s906_s1 + $0x40] sm:$0xf]  ;;  %v480_v3 = vor.u32 %v588_v59, %v479_v58 }
  0x10   :  { %272 = vmatpush.bf16.msra.mxu0 %v472_v46  ;;  %v579_v1 = vld [vmem:[%s906_s1 + $0x4c] sm:$0xf0]  ;;  %v778_v2 = vld [vmem:[%s907_s0] sm:$0xff]  ;;  %v441_v5 = vld [vmem:[%s906_s1 + $0x50] sm:$0xf0]  ;;  %v611_v7 = vmov 0   ;;  %v484_v8 = vor.u32 %v586_v61, %v481_v62 }
  0x11   :  { %322 = vmatpush.bf16.msrb.mxu1 %v512_v39  ;;  %298 = vmatpush.bf16.msra.mxu2 %v476_v49  ;;  %v577_v4 = vld [vmem:[%s906_s1 + $0x44] sm:$0xf]  ;;  %v61_v6 = vunpack.c.h.b16 %v778_v2  ;;  %v463_v9 = vld [vmem:[%s906_s1 + $0x68] sm:$0xf]  ;;  %v584_v10 = vld [vmem:[%s906_s1 + $0x74] sm:$0xf0]  ;;  %v440_v11 = vor.u32 %v579_v1, %v439_v0  ;;  %v60_v38 = vunpack.c.l.b16 %v778_v2 }
  0x12   :  { %348 = vmatpush.bf16.msrb.mxu3 %v516_v47  ;;  %610 = vset.pattern.permute.xlu0 %v611_v7  ;;  %v582_v13 = vld [vmem:[%s906_s1 + $0x6c] sm:$0xf]  ;;  %v465_v14 = vld [vmem:[%s906_s1 + $0x78] sm:$0xf0]  ;;  %v444_v15 = vor.u32 %v577_v4, %v441_v5  ;;  %v423_v16 = vld [vmem:[%s906_s1 + $0x20] sm:$0xf]  ;;  %v464_v18 = vor.u32 %v584_v10, %v463_v9 }
  0x13   :  { %v793_v12 = vpack.c.b16 %v61_v6, %v61_v6  ;;  %v575_v17 = vld [vmem:[%s906_s1 + $0x2c] sm:$0xf0]  ;;  %v573_v19 = vld [vmem:[%s906_s1 + $0x24] sm:$0xf]  ;;  %v425_v20 = vld [vmem:[%s906_s1 + $0x30] sm:$0xf0]  ;;  %v468_v21 = vor.u32 %v582_v13, %v465_v14  ;;  %v62_v52 = vpack.c.b16 %v60_v38, %v60_v38 }
  0x14   :  { %273 = vmatpush.bf16.msra.mxu0 %v456_v60  ;;  %v447_v22 = vld [vmem:[%s906_s1 + $0x48] sm:$0xf]  ;;  %v580_v23 = vld [vmem:[%s906_s1 + $0x54] sm:$0xf0]  ;;  %v407_v24 = vld [vmem:[%s906_s1] sm:$0xf]  ;;  %v424_v25 = vor.u32 %v575_v17, %v423_v16  ;;  %v428_v29 = vor.u32 %v573_v19, %v425_v20 }
  0x15   :  { %323 = vmatpush.bf16.msrb.mxu1 %v496_v53  ;;  %299 = vmatpush.bf16.msra.mxu2 %v460_v63  ;;  %v571_v26 = vld [vmem:[%s906_s1 + $0xc] sm:$0xf0]  ;;  %v578_v27 = vld [vmem:[%s906_s1 + $0x4c] sm:$0xf]  ;;  %v449_v28 = vld [vmem:[%s906_s1 + $0x58] sm:$0xf0]  ;;  %v448_v33 = vor.u32 %v580_v23, %v447_v22 }
  0x16   :  { %349 = vmatpush.bf16.msrb.mxu3 %v500_v57  ;;  %565 = vmatmul.msk.bf16.vlgmr.msra.gmra.mxu1 %vm265_vm0, %v793_v12  ;;  %v569_v30 = vld [vmem:[%s906_s1 + $0x4] sm:$0xf]  ;;  %v409_v31 = vld [vmem:[%s906_s1 + $0x10] sm:$0xf0]  ;;  %v431_v32 = vld [vmem:[%s906_s1 + $0x28] sm:$0xf]  ;;  %v452_v37 = vor.u32 %v578_v27, %v449_v28  ;;  %v408_v42 = vor.u32 %v571_v26, %v407_v24 }
  0x17   :  { %567 = vmatmul.msk.bf16.vlgmr.msra.gmra.mxu3 %vm265_vm0, %v793_v12  ;;  %v576_v34 = vld [vmem:[%s906_s1 + $0x34] sm:$0xf0]  ;;  %v606_v35 = vld [vmem:[%s906_s1 + $0x12c] sm:$0xf]  ;;  %v561_v36 = vld [vmem:[%s906_s1 + $0x138] sm:$0xf0]  ;;  %v412_v45 = vor.u32 %v569_v30, %v409_v31 }
  0x18   :  { %274 = vmatpush.bf16.msra.mxu0 %v440_v11  ;;  %v605_v39 = vld [vmem:[%s906_s1 + $0x124] sm:$0xf]  ;;  %v553_v40 = vld [vmem:[%s906_s1 + $0x130] sm:$0xf0]  ;;  %v574_v43 = vld [vmem:[%s906_s1 + $0x2c] sm:$0xf]  ;;  %v564_v46 = vor.u32 %v606_v35, %v561_v36  ;;  %v432_v47 = vor.u32 %v576_v34, %v431_v32 }
  0x19   :  { %324 = vmatpush.bf16.msrb.mxu1 %v480_v3  ;;  %300 = vmatpush.bf16.msra.mxu2 %v444_v15  ;;  %v373_v41 = vld [vmem:[%s908_s2] sm:$0xff]  ;;  %v433_v44 = vld [vmem:[%s906_s1 + $0x38] sm:$0xf0]  ;;  %v556_v48 = vor.u32 %v605_v39, %v553_v40  ;;  %v415_v49 = vld [vmem:[%s906_s1 + $0x8] sm:$0xf] }
  0x1a   :  { %350 = vmatpush.bf16.msrb.mxu3 %v484_v8  ;;  %376 = vperm.xlu0 %610, %v373_v41   ;;  %v602_v50 = vld [vmem:[%s906_s1 + $0x10c] sm:$0xf]  ;;  %v545_v51 = vld [vmem:[%s906_s1 + $0x118] sm:$0xf0]  ;;  %v436_v53 = vor.u32 %v574_v43, %v433_v44  ;;  %v572_v54 = vld [vmem:[%s906_s1 + $0x14] sm:$0xf0] }
  0x1b   :  { %v601_v55 = vld [vmem:[%s906_s1 + $0x104] sm:$0xf]  ;;  %v537_v56 = vld [vmem:[%s906_s1 + $0x110] sm:$0xf0]  ;;  %v570_v57 = vld [vmem:[%s906_s1 + $0xc] sm:$0xf]  ;;  %v548_v59 = vor.u32 %v602_v50, %v545_v51  ;;  %v416_v61 = vor.u32 %v572_v54, %v415_v49 }
  0x1c   :  { %275 = vmatpush.bf16.msra.mxu0 %v424_v25  ;;  %v417_v58 = vld [vmem:[%s906_s1 + $0x18] sm:$0xf0]  ;;  %v383_v60 = vld [vmem:[%s909_s3] sm:$0xff]  ;;  %v540_v62 = vor.u32 %v601_v55, %v537_v56 }
  0x1d   :  { %325 = vmatpush.bf16.msrb.mxu1 %v464_v18  ;;  %301 = vmatpush.bf16.msra.mxu2 %v428_v29  ;;  %v420_v63 = vor.u32 %v570_v57, %v417_v58 }
  0x1e   :  { %351 = vmatpush.bf16.msrb.mxu3 %v468_v21 }
  0x20   :  { %276 = vmatpush.bf16.msra.mxu0 %v408_v42 }
  0x21   :  { %326 = vmatpush.bf16.msrb.mxu1 %v448_v33  ;;  %302 = vmatpush.bf16.msra.mxu2 %v412_v45 }
  0x22   :  { %352 = vmatpush.bf16.msrb.mxu3 %v452_v37  ;;  %386 = vperm.xlu0 %610, %v383_v60  }
  0x23   :  { %277 = vmatmul.bf16.vlgmr.msra.gmra.mxu0 %v62_v52 }
  0x24   :  { %366 = vmatpush.bf16.msrb.mxu0 %v564_v46  ;;  %303 = vmatmul.bf16.vlgmr.msra.gmra.mxu2 %v62_v52 }
  0x25   :  { %327 = vmatpush.bf16.msrb.mxu1 %v432_v47  ;;  %314 = vmatpush.bf16.msrb.mxu2 %v556_v48 }
  0x26   :  { %353 = vmatpush.bf16.msrb.mxu3 %v436_v53 }
  0x28   :  { %367 = vmatpush.bf16.msrb.mxu0 %v548_v59 }
  0x29   :  { %328 = vmatpush.bf16.msrb.mxu1 %v416_v61  ;;  %315 = vmatpush.bf16.msrb.mxu2 %v540_v62 }
  0x2a   :  { %354 = vmatpush.bf16.msrb.mxu3 %v420_v63 }
  0x2c   :  { %329 = vmatmul.bf16.vlgmr.msrb.gmra.mxu1 %v62_v52 }
  0x2d   :  { %355 = vmatmul.bf16.vlgmr.msrb.gmra.mxu3 %v62_v52 }
  0x33   :  { %568 = vmatmul.msk.bf16.vlgmr.msrb.gmra.mxu0 %vm265_vm0, %v793_v12 }
  0x34   :  { %566 = vmatmul.msk.bf16.vlgmr.msrb.gmra.mxu2 %vm265_vm0, %v793_v12 }
  0x8c   :  { %v377_v5 = vpop.permute.xlu0 %376 }
  0x93   :  { %v291_v0 = vpop.f32.mrf.mxu1 }
  0x94   :  { %v387_v15 = vpop.permute.xlu0 %386 }
  0x9a   :  { %v343_v1 = vpop.f32.mrf.mxu3 }
  0x9b   :  { %v293_v2 = vpop.f32.mrf.mxu1 }
  0xa0   :  { %v278_v3 = vpop.f32.mrf.mxu0 }
  0xa1   :  { %v292_v18 = vadd.f32 %v291_v0, %v278_v3 }
  0xa2   :  { %v345_v4 = vpop.f32.mrf.mxu3 }
  0xa3   :  { %v379_v22 = vmul.f32 %v377_v5, %v292_v18 }
  0xa5   :  { %v389_v29 = vadd.f32 %v387_v15, %v379_v22 }
  0xa7   :  { %v304_v7 = vpop.f32.mrf.mxu2  ;;  %v393_v32 = vmax.f32 %v389_v29, 0.0 }
  0xa8   :  { %v280_v8 = vpop.f32.mrf.mxu0 }
  0xa9   :  { %v330_v6 = vpop.f32.mrf.mxu1 }
  0xaa   :  { %v344_v9 = vadd.f32 %v343_v1, %v330_v6 }
  0xac   :  { %v381_v13 = vmul.f32 %v377_v5, %v344_v9 }
  0xae   :  { %v391_v19 = vadd.f32 %v387_v15, %v381_v13 }
  0xaf   :  { %v306_v14 = vpop.f32.mrf.mxu2 }
  0xb0   :  { %v356_v10 = vpop.f32.mrf.mxu3  ;;  %v369_v16 = vpop.f32.mrf.mxu0  ;;  %v395_v23 = vmax.f32 %v391_v19, 0.0 }
  0xb1   :  { %v332_v11 = vpop.f32.mrf.mxu1  ;;  %v370_v17 = vadd.f32 %v369_v16, %v356_v10 }
  0xb3   :  { %v382_v12 = vmul.f32 %v377_v5, %v370_v17 }
  0xb5   :  { %v392_v20 = vadd.f32 %v387_v15, %v382_v12 }
  0xb7   :  { %v396_v24 = vmax.f32 %v392_v20, 0.0  ;;  %v317_v25 = vpop.f32.mrf.mxu2 }
  0xb8   :  { %v358_v21 = vpop.f32.mrf.mxu3  ;;  %v318_v26 = vadd.f32 %v317_v25, %v304_v7  ;;  %v371_v27 = vpop.f32.mrf.mxu0 }
  0xb9   :  { %v398_v28 = vpack.c.bf16 %v396_v24, %v395_v23 }
  0xba   :  { %v380_v30 = vmul.f32 %v377_v5, %v318_v26 }
  0xbb   :  { %400 = vst [vmem:[%s910_s4 + $0x8] sm:$0xff] %v398_v28 }
  0xbc   :  { %v390_v31 = vadd.f32 %v387_v15, %v380_v30 }
  0xbe   :  { %v394_v33 = vmax.f32 %v390_v31, 0.0 }
  0xbf   :  { %v319_v34 = vpop.f32.mrf.mxu2 }
  0xc0   :  { %v397_v35 = vpack.c.bf16 %v394_v33, %v393_v32 }
  0xc2   :  { %399 = vst [vmem:[%s910_s4] sm:$0xff] %v397_v35 }

// kernel: appearance_feature_extractor.7
= control target key start
LH: loop header
LB: loop body
LE: loop exit
PB: predicated region body
PF: predicated region fallthrough
CT: control target
= control target key end

     0   :  { %v537_v3 = vmov 0   ;;  %vm148_vm0 = vcmask 654336   ;;  %s898_s1 = inlined_call_operand.vmem [shape: bf16[80,512], index: 1, kind: input, shape index: {}]   ;;  %s899_s2 = inlined_call_operand.vmem [shape: f32[16,1], index: 2, kind: input, shape index: {}]   ;;  %s900_s0 = inlined_call_operand.vmem [shape: bf16[16,80], index: 0, kind: input, shape index: {}]   ;;  %s901_s4 = inlined_call_operand.vmem [shape: f32[512,128], index: 4, kind: input, shape index: {}]   ;;  %s902_s3 = inlined_call_operand.vmem [shape: f32[16,1], index: 3, kind: input, shape index: {}]   ;;  %s903_s5 = inlined_call_operand.vmem [shape: bf16[16,128], index: 5, kind: output, shape index: {}]  }
   0x1   :  { %v490_v0 = vld [vmem:[%s898_s1 + $0x80] sm:$0xf]  ;;  %v526_v1 = vld [vmem:[%s898_s1 + $0x8c] sm:$0xf0]  ;;  %v524_v2 = vld [vmem:[%s898_s1 + $0x84] sm:$0xf]  ;;  %535 = vset.pattern.permute.xlu0 %v537_v3  ;;  %536 = vset.pattern.permute.xlu1 %v537_v3 }
   0x2   :  { %v491_v4 = vor.u32 %v526_v1, %v490_v0  ;;  %v492_v5 = vld [vmem:[%s898_s1 + $0x90] sm:$0xf0]  ;;  %v498_v6 = vld [vmem:[%s898_s1 + $0x88] sm:$0xf]  ;;  %v527_v7 = vld [vmem:[%s898_s1 + $0x94] sm:$0xf0] }
   0x3   :  { %v495_v8 = vor.u32 %v524_v2, %v492_v5  ;;  %v499_v9 = vor.u32 %v527_v7, %v498_v6  ;;  %v525_v10 = vld [vmem:[%s898_s1 + $0x8c] sm:$0xf]  ;;  %v500_v11 = vld [vmem:[%s898_s1 + $0x98] sm:$0xf0]  ;;  %v474_v12 = vld [vmem:[%s898_s1 + $0x60] sm:$0xf] }
   0x4   :  { %155 = vmatpush.bf16.msra.mxu0 %v491_v4  ;;  %v503_v13 = vor.u32 %v525_v10, %v500_v11  ;;  %v522_v14 = vld [vmem:[%s898_s1 + $0x6c] sm:$0xf0]  ;;  %v520_v15 = vld [vmem:[%s898_s1 + $0x64] sm:$0xf]  ;;  %v476_v16 = vld [vmem:[%s898_s1 + $0x70] sm:$0xf0] }
   0x5   :  { %169 = vmatpush.bf16.msra.mxu1 %v495_v8  ;;  %183 = vmatpush.bf16.msra.mxu2 %v499_v9  ;;  %v475_v17 = vor.u32 %v522_v14, %v474_v12  ;;  %v479_v18 = vor.u32 %v520_v15, %v476_v16  ;;  %v482_v19 = vld [vmem:[%s898_s1 + $0x68] sm:$0xf]  ;;  %v523_v20 = vld [vmem:[%s898_s1 + $0x74] sm:$0xf0]  ;;  %v521_v21 = vld [vmem:[%s898_s1 + $0x6c] sm:$0xf] }
   0x6   :  { %197 = vmatpush.bf16.msra.mxu3 %v503_v13  ;;  %v483_v22 = vor.u32 %v523_v20, %v482_v19  ;;  %v484_v23 = vld [vmem:[%s898_s1 + $0x78] sm:$0xf0]  ;;  %v458_v24 = vld [vmem:[%s898_s1 + $0x40] sm:$0xf]  ;;  %v518_v25 = vld [vmem:[%s898_s1 + $0x4c] sm:$0xf0] }
   0x7   :  { %v487_v26 = vor.u32 %v521_v21, %v484_v23  ;;  %v516_v27 = vld [vmem:[%s898_s1 + $0x44] sm:$0xf]  ;;  %v460_v28 = vld [vmem:[%s898_s1 + $0x50] sm:$0xf0]  ;;  %v466_v29 = vld [vmem:[%s898_s1 + $0x48] sm:$0xf]  ;;  %v459_v30 = vor.u32 %v518_v25, %v458_v24 }
   0x8   :  { %156 = vmatpush.bf16.msra.mxu0 %v475_v17  ;;  %v519_v31 = vld [vmem:[%s898_s1 + $0x54] sm:$0xf0]  ;;  %v517_v32 = vld [vmem:[%s898_s1 + $0x4c] sm:$0xf]  ;;  %v468_v33 = vld [vmem:[%s898_s1 + $0x58] sm:$0xf0]  ;;  %v463_v34 = vor.u32 %v516_v27, %v460_v28 }
   0x9   :  { %170 = vmatpush.bf16.msra.mxu1 %v479_v18  ;;  %184 = vmatpush.bf16.msra.mxu2 %v483_v22  ;;  %v467_v35 = vor.u32 %v519_v31, %v466_v29  ;;  %v442_v36 = vld [vmem:[%s898_s1 + $0x20] sm:$0xf]  ;;  %v514_v37 = vld [vmem:[%s898_s1 + $0x2c] sm:$0xf0]  ;;  %v512_v38 = vld [vmem:[%s898_s1 + $0x24] sm:$0xf]  ;;  %v471_v39 = vor.u32 %v517_v32, %v468_v33 }
   0xa   :  { %198 = vmatpush.bf16.msra.mxu3 %v487_v26  ;;  %v444_v40 = vld [vmem:[%s898_s1 + $0x30] sm:$0xf0]  ;;  %v450_v41 = vld [vmem:[%s898_s1 + $0x28] sm:$0xf]  ;;  %v515_v42 = vld [vmem:[%s898_s1 + $0x34] sm:$0xf0]  ;;  %v443_v45 = vor.u32 %v514_v37, %v442_v36 }
   0xb   :  { %v513_v43 = vld [vmem:[%s898_s1 + $0x2c] sm:$0xf]  ;;  %v452_v44 = vld [vmem:[%s898_s1 + $0x38] sm:$0xf0]  ;;  %v426_v46 = vld [vmem:[%s898_s1] sm:$0xf]  ;;  %v447_v47 = vor.u32 %v512_v38, %v444_v40  ;;  %v451_v48 = vor.u32 %v515_v42, %v450_v41 }
   0xc   :  { %157 = vmatpush.bf16.msra.mxu0 %v459_v30  ;;  %v510_v49 = vld [vmem:[%s898_s1 + $0xc] sm:$0xf0]  ;;  %v508_v50 = vld [vmem:[%s898_s1 + $0x4] sm:$0xf]  ;;  %v428_v51 = vld [vmem:[%s898_s1 + $0x10] sm:$0xf0]  ;;  %v455_v52 = vor.u32 %v513_v43, %v452_v44 }
   0xd   :  { %171 = vmatpush.bf16.msra.mxu1 %v463_v34  ;;  %185 = vmatpush.bf16.msra.mxu2 %v467_v35  ;;  %v434_v53 = vld [vmem:[%s898_s1 + $0x8] sm:$0xf]  ;;  %v511_v54 = vld [vmem:[%s898_s1 + $0x14] sm:$0xf0]  ;;  %v208_v55 = vld [vmem:[%s899_s2] sm:$0xff]  ;;  %v427_v59 = vor.u32 %v510_v49, %v426_v46  ;;  %v431_v60 = vor.u32 %v508_v50, %v428_v51 }
   0xe   :  { %199 = vmatpush.bf16.msra.mxu3 %v471_v39  ;;  %v509_v56 = vld [vmem:[%s898_s1 + $0xc] sm:$0xf]  ;;  %v436_v57 = vld [vmem:[%s898_s1 + $0x18] sm:$0xf0]  ;;  %212 = vperm.xlu0 %535, %v208_v55   ;;  %v435_v61 = vor.u32 %v511_v54, %v434_v53  ;;  %v528_v63 = vld [vmem:[%s900_s0] sm:$0xff] }
   0xf   :  { %v209_v58 = vld [vmem:[%s899_s2 + $0x8] sm:$0xff]  ;;  %v439_v62 = vor.u32 %v509_v56, %v436_v57  ;;  %v271_v0 = vld [vmem:[%s901_s4 + $0x78] sm:$0xff]  ;;  %v228_v1 = vld [vmem:[%s902_s3] sm:$0xff] }
  0x10   :  { %158 = vmatpush.bf16.msra.mxu0 %v443_v45  ;;  %217 = vperm.xlu1 %536, %v209_v58   ;;  %v229_v2 = vld [vmem:[%s902_s3 + $0x8] sm:$0xff]  ;;  %v287_v3 = vld [vmem:[%s901_s4 + $0xf8] sm:$0xff]  ;;  %v270_v4 = vld [vmem:[%s901_s4 + $0x70] sm:$0xff] }
  0x11   :  { %172 = vmatpush.bf16.msra.mxu1 %v447_v47  ;;  %186 = vmatpush.bf16.msra.mxu2 %v451_v48  ;;  %v303_v5 = vld [vmem:[%s901_s4 + $0x178] sm:$0xff]  ;;  %v286_v7 = vld [vmem:[%s901_s4 + $0xf0] sm:$0xff]  ;;  %v269_v8 = vld [vmem:[%s901_s4 + $0x68] sm:$0xff] }
  0x12   :  { %200 = vmatpush.bf16.msra.mxu3 %v455_v52  ;;  %v319_v6 = vld [vmem:[%s901_s4 + $0x1f8] sm:$0xff]  ;;  %v302_v9 = vld [vmem:[%s901_s4 + $0x170] sm:$0xff]  ;;  %v285_v11 = vld [vmem:[%s901_s4 + $0xe8] sm:$0xff] }
  0x13   :  { %v318_v10 = vld [vmem:[%s901_s4 + $0x1f0] sm:$0xff]  ;;  %v268_v12 = vld [vmem:[%s901_s4 + $0x60] sm:$0xff]  ;;  %v301_v13 = vld [vmem:[%s901_s4 + $0x168] sm:$0xff] }
  0x14   :  { %159 = vmatpush.bf16.msra.mxu0 %v427_v59  ;;  %v317_v14 = vld [vmem:[%s901_s4 + $0x1e8] sm:$0xff]  ;;  %v284_v15 = vld [vmem:[%s901_s4 + $0xe0] sm:$0xff]  ;;  %v267_v16 = vld [vmem:[%s901_s4 + $0x58] sm:$0xff] }
  0x15   :  { %173 = vmatpush.bf16.msra.mxu1 %v431_v60  ;;  %187 = vmatpush.bf16.msra.mxu2 %v435_v61  ;;  %v300_v17 = vld [vmem:[%s901_s4 + $0x160] sm:$0xff]  ;;  %v283_v19 = vld [vmem:[%s901_s4 + $0xd8] sm:$0xff]  ;;  %v266_v20 = vld [vmem:[%s901_s4 + $0x50] sm:$0xff] }
  0x16   :  { %201 = vmatpush.bf16.msra.mxu3 %v439_v62  ;;  %232 = vperm.xlu0 %535, %v228_v1   ;;  %v316_v18 = vld [vmem:[%s901_s4 + $0x1e0] sm:$0xff]  ;;  %v299_v21 = vld [vmem:[%s901_s4 + $0x158] sm:$0xff]  ;;  %v282_v23 = vld [vmem:[%s901_s4 + $0xd0] sm:$0xff] }
  0x17   :  { %504 = vmatmul.msk.bf16.vlgmr.msra.gmra.mxu0 %vm148_vm0, %v528_v63  ;;  %v315_v22 = vld [vmem:[%s901_s4 + $0x1d8] sm:$0xff]  ;;  %v265_v24 = vld [vmem:[%s901_s4 + $0x48] sm:$0xff]  ;;  %v264_v26 = vld [vmem:[%s901_s4 + $0x40] sm:$0xff] }
  0x18   :  { %320 = vmatpush.msrb.mxu0 %v271_v0  ;;  %505 = vmatmul.msk.bf16.vlgmr.msra.gmra.mxu1 %vm148_vm0, %v528_v63  ;;  %v281_v25 = vld [vmem:[%s901_s4 + $0xc8] sm:$0xff]  ;;  %v280_v27 = vld [vmem:[%s901_s4 + $0xc0] sm:$0xff]  ;;  %v263_v28 = vld [vmem:[%s901_s4 + $0x38] sm:$0xff] }
  0x19   :  { %506 = vmatmul.msk.bf16.vlgmr.msra.gmra.mxu2 %vm148_vm0, %v528_v63  ;;  %507 = vmatmul.msk.bf16.vlgmr.msra.gmra.mxu3 %vm148_vm0, %v528_v63  ;;  %v279_v29 = vld [vmem:[%s901_s4 + $0xb8] sm:$0xff]  ;;  %v298_v30 = vld [vmem:[%s901_s4 + $0x150] sm:$0xff]  ;;  %v297_v34 = vld [vmem:[%s901_s4 + $0x148] sm:$0xff] }
  0x1a   :  { %237 = vperm.xlu1 %536, %v229_v2   ;;  %343 = vmatpush.msrb.mxu1 %v287_v3  ;;  %v314_v31 = vld [vmem:[%s901_s4 + $0x1d0] sm:$0xff]  ;;  %v313_v35 = vld [vmem:[%s901_s4 + $0x1c8] sm:$0xff]  ;;  %v296_v38 = vld [vmem:[%s901_s4 + $0x140] sm:$0xff] }
  0x1b   :  { %321 = vmatpush.msrb.mxu0 %v270_v4  ;;  %366 = vmatpush.msrb.mxu2 %v303_v5  ;;  %v262_v32 = vld [vmem:[%s901_s4 + $0x30] sm:$0xff]  ;;  %v261_v36 = vld [vmem:[%s901_s4 + $0x28] sm:$0xff]  ;;  %v312_v39 = vld [vmem:[%s901_s4 + $0x1c0] sm:$0xff] }
  0x1c   :  { %389 = vmatpush.msrb.mxu3 %v319_v6  ;;  %344 = vmatpush.msrb.mxu1 %v286_v7  ;;  %v278_v33 = vld [vmem:[%s901_s4 + $0xb0] sm:$0xff]  ;;  %v277_v37 = vld [vmem:[%s901_s4 + $0xa8] sm:$0xff]  ;;  %v260_v40 = vld [vmem:[%s901_s4 + $0x20] sm:$0xff] }
  0x1d   :  { %322 = vmatpush.msrb.mxu0 %v269_v8  ;;  %367 = vmatpush.msrb.mxu2 %v302_v9  ;;  %v276_v41 = vld [vmem:[%s901_s4 + $0xa0] sm:$0xff]  ;;  %v295_v42 = vld [vmem:[%s901_s4 + $0x138] sm:$0xff]  ;;  %v294_v46 = vld [vmem:[%s901_s4 + $0x130] sm:$0xff] }
  0x1e   :  { %390 = vmatpush.msrb.mxu3 %v318_v10  ;;  %345 = vmatpush.msrb.mxu1 %v285_v11  ;;  %v311_v43 = vld [vmem:[%s901_s4 + $0x1b8] sm:$0xff]  ;;  %v310_v47 = vld [vmem:[%s901_s4 + $0x1b0] sm:$0xff]  ;;  %v293_v50 = vld [vmem:[%s901_s4 + $0x128] sm:$0xff] }
  0x1f   :  { %323 = vmatpush.msrb.mxu0 %v268_v12  ;;  %368 = vmatpush.msrb.mxu2 %v301_v13  ;;  %v259_v44 = vld [vmem:[%s901_s4 + $0x18] sm:$0xff]  ;;  %v258_v48 = vld [vmem:[%s901_s4 + $0x10] sm:$0xff]  ;;  %v309_v51 = vld [vmem:[%s901_s4 + $0x1a8] sm:$0xff] }
  0x20   :  { %391 = vmatpush.msrb.mxu3 %v317_v14  ;;  %346 = vmatpush.msrb.mxu1 %v284_v15  ;;  %v275_v45 = vld [vmem:[%s901_s4 + $0x98] sm:$0xff]  ;;  %v274_v49 = vld [vmem:[%s901_s4 + $0x90] sm:$0xff]  ;;  %v257_v52 = vld [vmem:[%s901_s4 + $0x8] sm:$0xff] }
  0x21   :  { %324 = vmatpush.msrb.mxu0 %v267_v16  ;;  %369 = vmatpush.msrb.mxu2 %v300_v17  ;;  %v273_v53 = vld [vmem:[%s901_s4 + $0x88] sm:$0xff]  ;;  %v292_v54 = vld [vmem:[%s901_s4 + $0x120] sm:$0xff]  ;;  %v291_v58 = vld [vmem:[%s901_s4 + $0x118] sm:$0xff] }
  0x22   :  { %392 = vmatpush.msrb.mxu3 %v316_v18  ;;  %347 = vmatpush.msrb.mxu1 %v283_v19  ;;  %v308_v55 = vld [vmem:[%s901_s4 + $0x1a0] sm:$0xff]  ;;  %v307_v59 = vld [vmem:[%s901_s4 + $0x198] sm:$0xff]  ;;  %v290_v60 = vld [vmem:[%s901_s4 + $0x110] sm:$0xff] }
  0x23   :  { %325 = vmatpush.msrb.mxu0 %v266_v20  ;;  %370 = vmatpush.msrb.mxu2 %v299_v21  ;;  %v256_v56 = vld [vmem:[%s901_s4] sm:$0xff]  ;;  %v306_v61 = vld [vmem:[%s901_s4 + $0x190] sm:$0xff]  ;;  %v289_v62 = vld [vmem:[%s901_s4 + $0x108] sm:$0xff] }
  0x24   :  { %393 = vmatpush.msrb.mxu3 %v315_v22  ;;  %348 = vmatpush.msrb.mxu1 %v282_v23  ;;  %v272_v57 = vld [vmem:[%s901_s4 + $0x80] sm:$0xff]  ;;  %v305_v63 = vld [vmem:[%s901_s4 + $0x188] sm:$0xff] }
  0x25   :  { %326 = vmatpush.msrb.mxu0 %v265_v24  ;;  %371 = vmatpush.msrb.mxu2 %v298_v30  ;;  %v288_v0 = vld [vmem:[%s901_s4 + $0x100] sm:$0xff] }
  0x26   :  { %349 = vmatpush.msrb.mxu1 %v281_v25  ;;  %394 = vmatpush.msrb.mxu3 %v314_v31  ;;  %v304_v1 = vld [vmem:[%s901_s4 + $0x180] sm:$0xff] }
  0x27   :  { %327 = vmatpush.msrb.mxu0 %v264_v26  ;;  %372 = vmatpush.msrb.mxu2 %v297_v34 }
  0x28   :  { %350 = vmatpush.msrb.mxu1 %v280_v27  ;;  %395 = vmatpush.msrb.mxu3 %v313_v35 }
  0x29   :  { %328 = vmatpush.msrb.mxu0 %v263_v28  ;;  %373 = vmatpush.msrb.mxu2 %v296_v38 }
  0x2a   :  { %351 = vmatpush.msrb.mxu1 %v279_v29  ;;  %396 = vmatpush.msrb.mxu3 %v312_v39 }
  0x2b   :  { %329 = vmatpush.msrb.mxu0 %v262_v32  ;;  %374 = vmatpush.msrb.mxu2 %v295_v42 }
  0x2c   :  { %352 = vmatpush.msrb.mxu1 %v278_v33  ;;  %397 = vmatpush.msrb.mxu3 %v311_v43 }
  0x2d   :  { %330 = vmatpush.msrb.mxu0 %v261_v36  ;;  %375 = vmatpush.msrb.mxu2 %v294_v46 }
  0x2e   :  { %353 = vmatpush.msrb.mxu1 %v277_v37  ;;  %398 = vmatpush.msrb.mxu3 %v310_v47 }
  0x2f   :  { %331 = vmatpush.msrb.mxu0 %v260_v40  ;;  %376 = vmatpush.msrb.mxu2 %v293_v50 }
  0x30   :  { %354 = vmatpush.msrb.mxu1 %v276_v41  ;;  %399 = vmatpush.msrb.mxu3 %v309_v51 }
  0x31   :  { %332 = vmatpush.msrb.mxu0 %v259_v44  ;;  %377 = vmatpush.msrb.mxu2 %v292_v54 }
  0x32   :  { %355 = vmatpush.msrb.mxu1 %v275_v45  ;;  %400 = vmatpush.msrb.mxu3 %v308_v55 }
  0x33   :  { %333 = vmatpush.msrb.mxu0 %v258_v48  ;;  %378 = vmatpush.msrb.mxu2 %v291_v58 }
  0x34   :  { %356 = vmatpush.msrb.mxu1 %v274_v49  ;;  %401 = vmatpush.msrb.mxu3 %v307_v59 }
  0x35   :  { %334 = vmatpush.msrb.mxu0 %v257_v52  ;;  %379 = vmatpush.msrb.mxu2 %v290_v60 }
  0x36   :  { %357 = vmatpush.msrb.mxu1 %v273_v53  ;;  %402 = vmatpush.msrb.mxu3 %v306_v61 }
  0x37   :  { %335 = vmatpush.msrb.mxu0 %v256_v56  ;;  %380 = vmatpush.msrb.mxu2 %v289_v62 }
  0x38   :  { %358 = vmatpush.msrb.mxu1 %v272_v57  ;;  %403 = vmatpush.msrb.mxu3 %v305_v63 }
  0x39   :  { %381 = vmatpush.msrb.mxu2 %v288_v0 }
  0x3a   :  { %404 = vmatpush.msrb.mxu3 %v304_v1 }
  0x80   :  { %v213_v2 = vpop.permute.xlu0 %212 }
  0x82   :  { %v218_v3 = vpop.permute.xlu1 %217 }
  0x88   :  { %v233_v7 = vpop.permute.xlu0 %232 }
  0x8c   :  { %v238_v21 = vpop.permute.xlu1 %237 }
  0x94   :  { %v161_v4 = vpop.f32.mrf.mxu0 }
  0x95   :  { %v220_v5 = vmul.f32 %v213_v2, %v161_v4  ;;  %v175_v6 = vpop.f32.mrf.mxu1 }
  0x96   :  { %v221_v8 = vmul.f32 %v213_v2, %v175_v6 }
  0x97   :  { %v240_v9 = vadd.f32 %v233_v7, %v220_v5 }
  0x98   :  { %v241_v10 = vadd.f32 %v233_v7, %v221_v8 }
  0x99   :  { %v248_v11 = vmax.f32 %v240_v9, 0.0 }
  0x9a   :  { %v249_v12 = vmax.f32 %v241_v10, 0.0 }
  0x9b   :  { %336 = vmatmul.f32.vlgmr.msrb.gmra.mxu0 %v248_v11 }
  0x9c   :  { %v189_v13 = vpop.f32.mrf.mxu2  ;;  %v203_v15 = vpop.f32.mrf.mxu3  ;;  %359 = vmatmul.f32.vlgmr.msrb.gmra.mxu1 %v249_v12 }
  0x9d   :  { %v222_v14 = vmul.f32 %v213_v2, %v189_v13  ;;  %v163_v16 = vpop.f32.mrf.mxu0  ;;  %v223_v17 = vmul.f32 %v213_v2, %v203_v15  ;;  %v177_v19 = vpop.f32.mrf.mxu1 }
  0x9e   :  { %v224_v18 = vmul.f32 %v218_v3, %v163_v16  ;;  %v225_v22 = vmul.f32 %v218_v3, %v177_v19 }
  0x9f   :  { %v242_v20 = vadd.f32 %v233_v7, %v222_v14  ;;  %v243_v23 = vadd.f32 %v233_v7, %v223_v17 }
  0xa0   :  { %v244_v24 = vadd.f32 %v238_v21, %v224_v18  ;;  %v245_v26 = vadd.f32 %v238_v21, %v225_v22 }
  0xa1   :  { %v250_v25 = vmax.f32 %v242_v20, 0.0  ;;  %v251_v27 = vmax.f32 %v243_v23, 0.0 }
  0xa2   :  { %v252_v28 = vmax.f32 %v244_v24, 0.0  ;;  %v253_v29 = vmax.f32 %v245_v26, 0.0 }
  0xa3   :  { %382 = vmatmul.f32.vlgmr.msrb.gmra.mxu2 %v250_v25  ;;  %405 = vmatmul.f32.vlgmr.msrb.gmra.mxu3 %v251_v27 }
  0xa4   :  { %v191_v30 = vpop.f32.mrf.mxu2  ;;  %339 = vmatmul.f32.gmra.mxu0 %v252_v28  ;;  %v205_v32 = vpop.f32.mrf.mxu3  ;;  %362 = vmatmul.f32.gmra.mxu1 %v253_v29 }
  0xa5   :  { %v226_v31 = vmul.f32 %v218_v3, %v191_v30  ;;  %v227_v33 = vmul.f32 %v218_v3, %v205_v32 }
  0xa7   :  { %v246_v34 = vadd.f32 %v238_v21, %v226_v31  ;;  %v247_v35 = vadd.f32 %v238_v21, %v227_v33 }
  0xa9   :  { %v254_v36 = vmax.f32 %v246_v34, 0.0  ;;  %v255_v37 = vmax.f32 %v247_v35, 0.0 }
  0xab   :  { %385 = vmatmul.f32.gmra.mxu2 %v254_v36  ;;  %408 = vmatmul.f32.gmra.mxu3 %v255_v37 }
 0x118   :  { %v337_v38 = vpop.f32.mrf.mxu0 }
 0x119   :  { %v360_v39 = vpop.f32.mrf.mxu1 }
 0x11a   :  { %v361_v44 = vadd.f32 %v360_v39, %v337_v38 }
 0x121   :  { %v340_v42 = vpop.f32.mrf.mxu0  ;;  %v363_v43 = vpop.f32.mrf.mxu1 }
 0x122   :  { %v364_v45 = vadd.f32 %v363_v43, %v340_v42 }
 0x126   :  { %v383_v40 = vpop.f32.mrf.mxu2  ;;  %v406_v41 = vpop.f32.mrf.mxu3 }
 0x127   :  { %v384_v46 = vadd.f32 %v383_v40, %v361_v44 }
 0x129   :  { %v407_v50 = vadd.f32 %v406_v41, %v384_v46 }
 0x12e   :  { %v386_v47 = vpop.f32.mrf.mxu2  ;;  %v409_v49 = vpop.f32.mrf.mxu3 }
 0x12f   :  { %v387_v48 = vadd.f32 %v386_v47, %v364_v45 }
 0x131   :  { %v410_v51 = vadd.f32 %v409_v49, %v387_v48 }
 0x133   :  { %v532_v52 = vpack.c.bf16 %v410_v51, %v407_v50 }
 0x135   :  { %533 = vst [vmem:[%s903_s5] sm:$0xff] %v532_v52  }

// kernel: appearance_feature_extractor.9
= control target key start
LH: loop header
LB: loop body
LE: loop exit
PB: predicated region body
PF: predicated region fallthrough
CT: control target
= control target key end

     0   :  { %v303_v0 = vmov 0   ;;  %vm62_vm0 = vcmask 261120   ;;  %s407_s2 = inlined_call_operand.vmem [shape: f32[64,1], index: 2, kind: input, shape index: {}]   ;;  %s408_s1 = inlined_call_operand.vmem [shape: bf16[32,128], index: 1, kind: input, shape index: {}]   ;;  %s409_s0 = inlined_call_operand.vmem [shape: bf16[64,32], index: 0, kind: input, shape index: {}]   ;;  %s410_s3 = inlined_call_operand.vmem [shape: f32[64,1], index: 3, kind: input, shape index: {}]   ;;  %s411_s4 = inlined_call_operand.vmem [shape: bf16[64,128], index: 4, kind: output, shape index: {}]  }
   0x1   :  { %302 = vset.pattern.permute.xlu2 %v303_v0  ;;  %301 = vset.pattern.permute.xlu1 %v303_v0  ;;  %v108_v1 = vld [vmem:[%s407_s2 + $0x20] sm:$0xff]  ;;  %v106_v2 = vld [vmem:[%s407_s2 + $0x10] sm:$0xff]  ;;  %v265_v4 = vld [vmem:[%s408_s1 + $0x8] sm:$0xff] }
   0x2   :  { %v104_v3 = vld [vmem:[%s407_s2] sm:$0xff]  ;;  %300 = vset.pattern.permute.xlu0 %v303_v0  ;;  %134 = vperm.xlu2 %302, %v108_v1   ;;  %v109_v6 = vld [vmem:[%s407_s2 + $0x28] sm:$0xff]  ;;  %v107_v7 = vld [vmem:[%s407_s2 + $0x18] sm:$0xff] }
   0x3   :  { %124 = vperm.xlu1 %301, %v106_v2   ;;  %114 = vperm.xlu0 %300, %v104_v3   ;;  %v264_v5 = vld [vmem:[%s408_s1] sm:$0xff]  ;;  %v105_v8 = vld [vmem:[%s407_s2 + $0x8] sm:$0xff]  ;;  %v268_v11 = vld [vmem:[%s409_s0 + $0x10] sm:$0xff] }
   0x4   :  { %81 = vmatpush.bf16.msra.mxu0 %v265_v4  ;;  %293 = vmatpush.bf16.msra.mxu1 %v265_v4  ;;  %v266_v9 = vld [vmem:[%s409_s0] sm:$0xff]  ;;  %v267_v10 = vld [vmem:[%s409_s0 + $0x8] sm:$0xff]  ;;  %v269_v12 = vld [vmem:[%s409_s0 + $0x18] sm:$0xff] }
   0x5   :  { %294 = vmatpush.bf16.msra.mxu2 %v265_v4  ;;  %295 = vmatpush.bf16.msra.mxu3 %v265_v4  ;;  %v160_v13 = vld [vmem:[%s410_s3] sm:$0xff]  ;;  %v111_v14 = vld [vmem:[%s407_s2 + $0x38] sm:$0xff]  ;;  %v110_v15 = vld [vmem:[%s407_s2 + $0x30] sm:$0xff] }
   0x6   :  { %v163_v16 = vld [vmem:[%s410_s3 + $0x18] sm:$0xff]  ;;  %v162_v17 = vld [vmem:[%s410_s3 + $0x10] sm:$0xff]  ;;  %v161_v18 = vld [vmem:[%s410_s3 + $0x8] sm:$0xff] }
   0x7   :  { %v166_v19 = vld [vmem:[%s410_s3 + $0x30] sm:$0xff]  ;;  %v165_v20 = vld [vmem:[%s410_s3 + $0x28] sm:$0xff]  ;;  %v164_v21 = vld [vmem:[%s410_s3 + $0x20] sm:$0xff] }
   0x8   :  { %82 = vmatpush.bf16.msra.mxu0 %v264_v5  ;;  %296 = vmatpush.bf16.msra.mxu1 %v264_v5  ;;  %v167_v22 = vld [vmem:[%s410_s3 + $0x38] sm:$0xff] }
   0x9   :  { %297 = vmatpush.bf16.msra.mxu2 %v264_v5  ;;  %298 = vmatpush.bf16.msra.mxu3 %v264_v5 }
   0xa   :  { %139 = vperm.xlu2 %302, %v109_v6  }
   0xb   :  { %129 = vperm.xlu1 %301, %v107_v7   ;;  %119 = vperm.xlu0 %300, %v105_v8  }
   0xc   :  { %260 = vmatmul.msk.bf16.vlgmr.msra.gmra.mxu0 %vm62_vm0, %v266_v9  ;;  %261 = vmatmul.msk.bf16.vlgmr.msra.gmra.mxu1 %vm62_vm0, %v267_v10 }
   0xd   :  { %262 = vmatmul.msk.bf16.vlgmr.msra.gmra.mxu2 %vm62_vm0, %v268_v11  ;;  %263 = vmatmul.msk.bf16.vlgmr.msra.gmra.mxu3 %vm62_vm0, %v269_v12 }
  0x12   :  { %170 = vperm.xlu2 %302, %v160_v13  }
  0x13   :  { %149 = vperm.xlu1 %301, %v111_v14   ;;  %144 = vperm.xlu0 %300, %v110_v15  }
  0x1a   :  { %185 = vperm.xlu2 %302, %v163_v16  }
  0x1b   :  { %180 = vperm.xlu1 %301, %v162_v17   ;;  %175 = vperm.xlu0 %300, %v161_v18  }
  0x22   :  { %200 = vperm.xlu2 %302, %v166_v19  }
  0x23   :  { %195 = vperm.xlu1 %301, %v165_v20   ;;  %190 = vperm.xlu0 %300, %v164_v21  }
  0x2b   :  { %205 = vperm.xlu0 %300, %v167_v22  }
  0x5c   :  { %v135_v23 = vpop.permute.xlu2 %134 }
  0x64   :  { %v140_v28 = vpop.permute.xlu2 %139 }
  0x6c   :  { %v171_v31 = vpop.permute.xlu2 %170 }
  0x74   :  { %v186_v44 = vpop.permute.xlu2 %185 }
  0x75   :  { %v125_v24 = vpop.permute.xlu1 %124  ;;  %v115_v25 = vpop.permute.xlu0 %114 }
  0x7c   :  { %v201_v61 = vpop.permute.xlu2 %200 }
  0x7d   :  { %v130_v26 = vpop.permute.xlu1 %129  ;;  %v120_v27 = vpop.permute.xlu0 %119 }
  0x85   :  { %v150_v29 = vpop.permute.xlu1 %149  ;;  %v145_v30 = vpop.permute.xlu0 %144 }
  0x89   :  { %v84_v32 = vpop.f32.mrf.mxu0  ;;  %v89_v33 = vpop.f32.mrf.mxu1 }
  0x8a   :  { %v152_v36 = vmul.f32 %v115_v25, %v84_v32  ;;  %v154_v41 = vmul.f32 %v125_v24, %v89_v33 }
  0x8c   :  { %v208_v45 = vadd.f32 %v171_v31, %v152_v36 }
  0x8d   :  { %v176_v34 = vpop.permute.xlu0 %175  ;;  %v181_v35 = vpop.permute.xlu1 %180 }
  0x8e   :  { %v210_v46 = vadd.f32 %v181_v35, %v154_v41 }
  0x90   :  { %v94_v37 = vpop.f32.mrf.mxu2  ;;  %v99_v38 = vpop.f32.mrf.mxu3 }
  0x91   :  { %v86_v39 = vpop.f32.mrf.mxu0  ;;  %v91_v40 = vpop.f32.mrf.mxu1  ;;  %v156_v53 = vmul.f32 %v135_v23, %v94_v37  ;;  %v158_v56 = vmul.f32 %v145_v30, %v99_v38 }
  0x92   :  { %v153_v42 = vmul.f32 %v120_v27, %v86_v39  ;;  %v155_v43 = vmul.f32 %v130_v26, %v91_v40 }
  0x93   :  { %v214_v0 = vadd.f32 %v201_v61, %v158_v56 }
  0x94   :  { %v209_v47 = vadd.f32 %v176_v34, %v153_v42  ;;  %v211_v48 = vadd.f32 %v186_v44, %v155_v43 }
  0x95   :  { %v191_v49 = vpop.permute.xlu0 %190  ;;  %v196_v57 = vpop.permute.xlu1 %195 }
  0x96   :  { %v273_v50 = vpack.c.bf16 %v209_v47, %v208_v45  ;;  %v278_v51 = vpack.c.bf16 %v211_v48, %v210_v46  ;;  %v212_v58 = vadd.f32 %v191_v49, %v156_v53 }
  0x98   :  { %274 = vst [vmem:[%s411_s4] sm:$0xff] %v273_v50   ;;  %v96_v52 = vpop.f32.mrf.mxu2  ;;  %v101_v55 = vpop.f32.mrf.mxu3 }
  0x99   :  { %290 = vst [vmem:[%s411_s4 + $0x8] sm:$0xff] %v278_v51   ;;  %v157_v54 = vmul.f32 %v140_v28, %v96_v52  ;;  %v159_v60 = vmul.f32 %v150_v29, %v101_v55 }
  0x9b   :  { %v213_v59 = vadd.f32 %v196_v57, %v157_v54 }
  0x9d   :  { %v283_v62 = vpack.c.bf16 %v213_v59, %v212_v58  ;;  %v206_v63 = vpop.permute.xlu0 %205 }
  0x9e   :  { %v215_v1 = vadd.f32 %v206_v63, %v159_v60 }
  0x9f   :  { %291 = vst [vmem:[%s411_s4 + $0x10] sm:$0xff] %v283_v62  }
  0xa0   :  { %v288_v2 = vpack.c.bf16 %v215_v1, %v214_v0 }
  0xa2   :  { %292 = vst [vmem:[%s411_s4 + $0x18] sm:$0xff] %v288_v2  }

// kernel: appearance_feature_extractor.8
= control target key start
LH: loop header
LB: loop body
LE: loop exit
PB: predicated region body
PF: predicated region fallthrough
CT: control target
= control target key end

     0   :  { %v373_v1 = vmov 0   ;;  %vm115_vm0 = vcmask 130048   ;;  %vm269_vm1 = vcmask 257024   ;;  %s541_s1 = inlined_call_operand.vmem [shape: bf16[144,128], index: 1, kind: input, shape index: {}]   ;;  %s542_s0 = inlined_call_operand.vmem [shape: bf16[32,144], index: 0, kind: input, shape index: {}]   ;;  %s543_s2 = inlined_call_operand.vmem [shape: f32[32,1], index: 2, kind: input, shape index: {}]   ;;  %s544_s4 = inlined_call_operand.vmem [shape: f32[128,32], index: 4, kind: input, shape index: {}]   ;;  %s545_s3 = inlined_call_operand.vmem [shape: f32[32,1], index: 3, kind: input, shape index: {}]   ;;  %s546_s5 = inlined_call_operand.vmem [shape: bf16[32,32], index: 5, kind: output, shape index: {}]  }
   0x1   :  { %v339_v0 = vld [vmem:[%s541_s1 + $0x38] sm:$0xff]  ;;  %370 = vset.pattern.permute.xlu0 %v373_v1  ;;  %371 = vset.pattern.permute.xlu1 %v373_v1  ;;  %v338_v2 = vld [vmem:[%s541_s1 + $0x30] sm:$0xff]  ;;  %v340_v3 = vld [vmem:[%s541_s1 + $0x40] sm:$0xff] }
   0x2   :  { %372 = vset.pattern.permute.xlu2 %v373_v1  ;;  %122 = vmatpush.bf16.msra.mxu0 %v339_v0  ;;  %v341_v4 = vld [vmem:[%s542_s0 + $0x4] sm:$0xf]  ;;  %v282_v5 = vld [vmem:[%s542_s0 + $0x8] sm:$0xf0]  ;;  %v162_v8 = vld [vmem:[%s543_s2 + $0x10] sm:$0xff] }
   0x3   :  { %345 = vmatpush.bf16.msra.mxu3 %v339_v0  ;;  %v285_v6 = vor.u32 %v341_v4, %v282_v5  ;;  %v161_v7 = vld [vmem:[%s543_s2 + $0x8] sm:$0xff]  ;;  %148 = vmatpush.bf16.msra.mxu1 %v340_v3  ;;  %v163_v10 = vld [vmem:[%s543_s2 + $0x18] sm:$0xff]  ;;  %v234_v12 = vld [vmem:[%s544_s4 + $0x70] sm:$0xff] }
   0x4   :  { %171 = vperm.xlu0 %370, %v161_v7   ;;  %176 = vperm.xlu1 %371, %v162_v8   ;;  %v337_v9 = vld [vmem:[%s541_s1 + $0x28] sm:$0xff]  ;;  %v235_v11 = vld [vmem:[%s544_s4 + $0x78] sm:$0xff]  ;;  %v336_v14 = vld [vmem:[%s541_s1 + $0x20] sm:$0xff] }
   0x5   :  { %181 = vperm.xlu2 %372, %v163_v10   ;;  %v189_v13 = vld [vmem:[%s545_s3 + $0x8] sm:$0xff]  ;;  %353 = vmatpush.msra.mxu2 %v235_v11  ;;  %v190_v15 = vld [vmem:[%s545_s3 + $0x10] sm:$0xff]  ;;  %v232_v17 = vld [vmem:[%s544_s4 + $0x60] sm:$0xff] }
   0x6   :  { %123 = vmatpush.bf16.msra.mxu0 %v338_v2  ;;  %330 = vmatmul.msk.bf16.vlgmr.msra.gmra.mxu1 %vm115_vm0, %v285_v6  ;;  %v233_v16 = vld [vmem:[%s544_s4 + $0x68] sm:$0xff]  ;;  %v191_v18 = vld [vmem:[%s545_s3 + $0x18] sm:$0xff]  ;;  %v343_v20 = vld [vmem:[%s542_s0 + $0x14] sm:$0xf] }
   0x7   :  { %346 = vmatpush.bf16.msra.mxu3 %v338_v2  ;;  %236 = vmatpush.msrb.mxu1 %v235_v11  ;;  %v335_v19 = vld [vmem:[%s541_s1 + $0x18] sm:$0xff]  ;;  %v160_v22 = vld [vmem:[%s543_s2] sm:$0xff]  ;;  %v334_v23 = vld [vmem:[%s541_s1 + $0x10] sm:$0xff] }
   0x8   :  { %354 = vmatpush.msra.mxu2 %v234_v12  ;;  %v290_v21 = vld [vmem:[%s542_s0 + $0x18] sm:$0xf0]  ;;  %v188_v24 = vld [vmem:[%s545_s3] sm:$0xff]  ;;  %v333_v26 = vld [vmem:[%s541_s1 + $0x8] sm:$0xff] }
   0x9   :  { %237 = vmatpush.msrb.mxu1 %v234_v12  ;;  %v293_v25 = vor.u32 %v343_v20, %v290_v21  ;;  %v332_v27 = vld [vmem:[%s541_s1] sm:$0xff]  ;;  %v342_v29 = vld [vmem:[%s542_s0 + $0x4] sm:$0xf0]  ;;  %v288_v30 = vld [vmem:[%s542_s0 + $0x10] sm:$0xf] }
   0xa   :  { %124 = vmatpush.bf16.msra.mxu0 %v337_v9  ;;  %355 = vmatpush.msra.mxu2 %v233_v16  ;;  %v280_v28 = vld [vmem:[%s542_s0] sm:$0xf]  ;;  %v344_v31 = vld [vmem:[%s542_s0 + $0x14] sm:$0xf0]  ;;  %v230_v35 = vld [vmem:[%s544_s4 + $0x50] sm:$0xff] }
   0xb   :  { %347 = vmatpush.bf16.msra.mxu3 %v337_v9  ;;  %238 = vmatpush.msrb.mxu1 %v233_v16  ;;  %v281_v32 = vor.u32 %v342_v29, %v280_v28  ;;  %v289_v33 = vor.u32 %v344_v31, %v288_v30  ;;  %v231_v34 = vld [vmem:[%s544_s4 + $0x58] sm:$0xff]  ;;  %v229_v36 = vld [vmem:[%s544_s4 + $0x48] sm:$0xff]  ;;  %v228_v37 = vld [vmem:[%s544_s4 + $0x40] sm:$0xff] }
   0xc   :  { %199 = vperm.xlu0 %370, %v189_v13   ;;  %204 = vperm.xlu1 %371, %v190_v15   ;;  %v227_v38 = vld [vmem:[%s544_s4 + $0x38] sm:$0xff]  ;;  %v226_v39 = vld [vmem:[%s544_s4 + $0x30] sm:$0xff]  ;;  %v225_v40 = vld [vmem:[%s544_s4 + $0x28] sm:$0xff] }
   0xd   :  { %239 = vmatpush.msrb.mxu1 %v232_v17  ;;  %209 = vperm.xlu2 %372, %v191_v18   ;;  %v224_v41 = vld [vmem:[%s544_s4 + $0x20] sm:$0xff]  ;;  %v223_v42 = vld [vmem:[%s544_s4 + $0x18] sm:$0xff]  ;;  %v222_v43 = vld [vmem:[%s544_s4 + $0x10] sm:$0xff] }
   0xe   :  { %125 = vmatpush.bf16.msra.mxu0 %v336_v14  ;;  %356 = vmatpush.msra.mxu2 %v232_v17  ;;  %v221_v44 = vld [vmem:[%s544_s4 + $0x8] sm:$0xff]  ;;  %v220_v45 = vld [vmem:[%s544_s4] sm:$0xff] }
   0xf   :  { %348 = vmatpush.bf16.msra.mxu3 %v336_v14  ;;  %240 = vmatpush.msrb.mxu1 %v231_v34 }
  0x10   :  { %357 = vmatpush.msra.mxu2 %v231_v34 }
  0x11   :  { %241 = vmatpush.msrb.mxu1 %v230_v35 }
  0x12   :  { %126 = vmatpush.bf16.msra.mxu0 %v335_v19  ;;  %358 = vmatpush.msra.mxu2 %v230_v35 }
  0x13   :  { %349 = vmatpush.bf16.msra.mxu3 %v335_v19  ;;  %242 = vmatpush.msrb.mxu1 %v229_v36 }
  0x14   :  { %166 = vperm.xlu0 %370, %v160_v22   ;;  %194 = vperm.xlu1 %371, %v188_v24  }
  0x15   :  { %359 = vmatpush.msra.mxu2 %v229_v36  ;;  %243 = vmatpush.msrb.mxu1 %v228_v37 }
  0x16   :  { %127 = vmatpush.bf16.msra.mxu0 %v334_v23  ;;  %331 = vmatmul.msk.bf16.gmra.mxu1 %vm115_vm0, %v293_v25 }
  0x17   :  { %350 = vmatpush.bf16.msra.mxu3 %v334_v23  ;;  %360 = vmatpush.msra.mxu2 %v228_v37 }
  0x18   :  { %244 = vmatpush.msrb.mxu1 %v227_v38 }
  0x19   :  { %361 = vmatpush.msra.mxu2 %v227_v38 }
  0x1a   :  { %128 = vmatpush.bf16.msra.mxu0 %v333_v26  ;;  %245 = vmatpush.msrb.mxu1 %v226_v39 }
  0x1b   :  { %351 = vmatpush.bf16.msra.mxu3 %v333_v26  ;;  %362 = vmatpush.msra.mxu2 %v226_v39 }
  0x1c   :  { %246 = vmatpush.msrb.mxu1 %v225_v40 }
  0x1d   :  { %363 = vmatpush.msra.mxu2 %v225_v40 }
  0x1e   :  { %129 = vmatpush.bf16.msra.mxu0 %v332_v27  ;;  %247 = vmatpush.msrb.mxu1 %v224_v41 }
  0x1f   :  { %352 = vmatpush.bf16.msra.mxu3 %v332_v27  ;;  %364 = vmatpush.msra.mxu2 %v224_v41 }
  0x20   :  { %248 = vmatpush.msrb.mxu1 %v223_v42 }
  0x21   :  { %130 = vmatmul.bf16.vlgmr.msra.gmra.mxu0 %v281_v32  ;;  %365 = vmatpush.msra.mxu2 %v223_v42 }
  0x22   :  { %135 = vmatmul.bf16.vlgmr.msra.gmra.mxu3 %v289_v33  ;;  %249 = vmatpush.msrb.mxu1 %v222_v43 }
  0x23   :  { %366 = vmatpush.msra.mxu2 %v222_v43 }
  0x24   :  { %250 = vmatpush.msrb.mxu1 %v221_v44 }
  0x25   :  { %367 = vmatpush.msra.mxu2 %v221_v44 }
  0x26   :  { %251 = vmatpush.msrb.mxu1 %v220_v45 }
  0x27   :  { %368 = vmatpush.msra.mxu2 %v220_v45 }
  0x5f   :  { %v182_v2 = vpop.permute.xlu2 %181 }
  0x67   :  { %v210_v11 = vpop.permute.xlu2 %209 }
  0x76   :  { %v172_v46 = vpop.permute.xlu0 %171  ;;  %v177_v47 = vpop.permute.xlu1 %176 }
  0x7e   :  { %v200_v49 = vpop.permute.xlu0 %199  ;;  %v205_v50 = vpop.permute.xlu1 %204 }
  0x83   :  { %v150_v48 = vpop.f32.mrf.mxu1 }
  0x86   :  { %v167_v53 = vpop.permute.xlu0 %166  ;;  %v195_v55 = vpop.permute.xlu1 %194 }
  0x8b   :  { %v152_v51 = vpop.f32.mrf.mxu1 }
  0x93   :  { %v155_v59 = vpop.f32.mrf.mxu1 }
  0x9b   :  { %v157_v6 = vpop.f32.mrf.mxu1 }
  0x9e   :  { %v131_v52 = vpop.f32.mrf.mxu0 }
  0x9f   :  { %v151_v54 = vadd.f32 %v150_v48, %v131_v52 }
  0xa1   :  { %v184_v56 = vmul.f32 %v167_v53, %v151_v54 }
  0xa3   :  { %v212_v57 = vadd.f32 %v195_v55, %v184_v56 }
  0xa5   :  { %v136_v58 = vpop.f32.mrf.mxu3  ;;  %v216_v60 = vmax.f32 %v212_v57, 0.0 }
  0xa6   :  { %v133_v61 = vpop.f32.mrf.mxu0  ;;  %v156_v0 = vadd.f32 %v155_v59, %v136_v58 }
  0xa7   :  { %v153_v62 = vadd.f32 %v152_v51, %v133_v61  ;;  %252 = vmatmul.f32.vlgmr.msrb.gmra.mxu1 %v216_v60 }
  0xa8   :  { %v186_v3 = vmul.f32 %v177_v47, %v156_v0 }
  0xa9   :  { %v185_v63 = vmul.f32 %v172_v46, %v153_v62 }
  0xaa   :  { %v214_v8 = vadd.f32 %v205_v50, %v186_v3 }
  0xab   :  { %v213_v1 = vadd.f32 %v200_v49, %v185_v63 }
  0xac   :  { %v218_v10 = vmax.f32 %v214_v8, 0.0 }
  0xad   :  { %v217_v4 = vmax.f32 %v213_v1, 0.0  ;;  %v138_v5 = vpop.f32.mrf.mxu3 }
  0xae   :  { %v158_v7 = vadd.f32 %v157_v6, %v138_v5 }
  0xaf   :  { %255 = vmatmul.f32.vlgmr.msra.gmra.mxu2 %v217_v4 }
  0xb0   :  { %v187_v9 = vmul.f32 %v182_v2, %v158_v7 }
  0xb2   :  { %v215_v12 = vadd.f32 %v210_v11, %v187_v9 }
  0xb4   :  { %v219_v13 = vmax.f32 %v215_v12, 0.0 }
  0xb7   :  { %258 = vmatmul.f32.gmra.mxu2 %v218_v10 }
  0xbf   :  { %261 = vmatmul.f32.gmra.mxu2 %v219_v13 }
 0x124   :  { %v253_v14 = vpop.f32.mrf.mxu1 }
 0x125   :  { %v265_v15 = vpack.c.bf16 %v253_v14, %v253_v14 }
 0x127   :  { %270 = vst.msk [vmem:[%s546_s5] sm:$0xf] %vm269_vm1, %v265_v15 }
 0x132   :  { %v256_v16 = vpop.f32.mrf.mxu2 }
 0x133   :  { %v266_v17 = vpack.c.bf16 %v256_v16, %v256_v16 }
 0x135   :  { %271 = vst.msk [vmem:[%s546_s5 + $0x4] sm:$0xf] %vm269_vm1, %v266_v17 }
 0x13a   :  { %v259_v18 = vpop.f32.mrf.mxu2 }
 0x13b   :  { %v267_v19 = vpack.c.bf16 %v259_v18, %v259_v18 }
 0x13d   :  { %272 = vst.msk [vmem:[%s546_s5 + $0x8] sm:$0xf] %vm269_vm1, %v267_v19 }
 0x142   :  { %v262_v20 = vpop.f32.mrf.mxu2 }
 0x143   :  { %v268_v21 = vpack.c.bf16 %v262_v20, %v262_v20 }
 0x145   :  { %273 = vst.msk [vmem:[%s546_s5 + $0xc] sm:$0xf] %vm269_vm1, %v268_v21 }

// kernel: appearance_feature_extractor.10
= control target key start
LH: loop header
LB: loop body
LE: loop exit
PB: predicated region body
PF: predicated region fallthrough
CT: control target
= control target key end

     0   :  { %v1254_v0 = vmov 0   ;;  %vm992_vm0 = vcmask 392192   ;;  %s1952_s4 = inlined_call_operand.vmem [shape: f32[432,1], index: 4, kind: input, shape index: {}]   ;;  %s1953_s5 = inlined_call_operand.vmem [shape: f32[432,1], index: 5, kind: input, shape index: {}]   ;;  %s1954_s1 = inlined_call_operand.vmem [shape: bf16[432,128], index: 1, kind: input, shape index: {}]   ;;  %s1955_s3 = inlined_call_operand.vmem [shape: f32[16,1], index: 3, kind: input, shape index: {}]   ;;  %s1956_s2 = inlined_call_operand.vmem [shape: f32[16,1], index: 2, kind: input, shape index: {}]   ;;  %s1957_s0 = inlined_call_operand.vmem [shape: bf16[16,432], index: 0, kind: input, shape index: {}]   ;;  %s1958_s6 = inlined_call_operand.vmem [shape: bf16[16,128], index: 6, kind: output, shape index: {}]  }
   0x1   :  { %1253 = vset.pattern.permute.xlu2 %v1254_v0  ;;  %1252 = vset.pattern.permute.xlu1 %v1254_v0  ;;  %v136_v1 = vld [vmem:[%s1952_s4 + $0x20] sm:$0xff]  ;;  %v134_v2 = vld [vmem:[%s1952_s4 + $0x10] sm:$0xff]  ;;  %v137_v4 = vld [vmem:[%s1952_s4 + $0x28] sm:$0xff] }
   0x2   :  { %v132_v3 = vld [vmem:[%s1952_s4] sm:$0xff]  ;;  %1251 = vset.pattern.permute.xlu0 %v1254_v0  ;;  %208 = vperm.xlu2 %1253, %v136_v1   ;;  %v135_v5 = vld [vmem:[%s1952_s4 + $0x18] sm:$0xff]  ;;  %v133_v6 = vld [vmem:[%s1952_s4 + $0x8] sm:$0xff] }
   0x3   :  { %198 = vperm.xlu1 %1252, %v134_v2   ;;  %188 = vperm.xlu0 %1251, %v132_v3   ;;  %v140_v7 = vld [vmem:[%s1952_s4 + $0x40] sm:$0xff]  ;;  %v139_v8 = vld [vmem:[%s1952_s4 + $0x38] sm:$0xff]  ;;  %v138_v9 = vld [vmem:[%s1952_s4 + $0x30] sm:$0xff] }
   0x4   :  { %v143_v10 = vld [vmem:[%s1952_s4 + $0x58] sm:$0xff]  ;;  %v142_v11 = vld [vmem:[%s1952_s4 + $0x50] sm:$0xff]  ;;  %v141_v12 = vld [vmem:[%s1952_s4 + $0x48] sm:$0xff] }
   0x5   :  { %v146_v13 = vld [vmem:[%s1952_s4 + $0x70] sm:$0xff]  ;;  %v145_v14 = vld [vmem:[%s1952_s4 + $0x68] sm:$0xff]  ;;  %v144_v15 = vld [vmem:[%s1952_s4 + $0x60] sm:$0xff] }
   0x6   :  { %v149_v16 = vld [vmem:[%s1952_s4 + $0x88] sm:$0xff]  ;;  %v148_v17 = vld [vmem:[%s1952_s4 + $0x80] sm:$0xff]  ;;  %v147_v18 = vld [vmem:[%s1952_s4 + $0x78] sm:$0xff] }
   0x7   :  { %v152_v19 = vld [vmem:[%s1952_s4 + $0xa0] sm:$0xff]  ;;  %v151_v20 = vld [vmem:[%s1952_s4 + $0x98] sm:$0xff]  ;;  %v150_v21 = vld [vmem:[%s1952_s4 + $0x90] sm:$0xff] }
   0x8   :  { %v155_v22 = vld [vmem:[%s1952_s4 + $0xb8] sm:$0xff]  ;;  %v154_v23 = vld [vmem:[%s1952_s4 + $0xb0] sm:$0xff]  ;;  %v153_v24 = vld [vmem:[%s1952_s4 + $0xa8] sm:$0xff] }
   0x9   :  { %v158_v25 = vld [vmem:[%s1952_s4 + $0xd0] sm:$0xff]  ;;  %v157_v26 = vld [vmem:[%s1952_s4 + $0xc8] sm:$0xff]  ;;  %v156_v27 = vld [vmem:[%s1952_s4 + $0xc0] sm:$0xff] }
   0xa   :  { %213 = vperm.xlu2 %1253, %v137_v4   ;;  %v161_v28 = vld [vmem:[%s1952_s4 + $0xe8] sm:$0xff]  ;;  %v160_v29 = vld [vmem:[%s1952_s4 + $0xe0] sm:$0xff]  ;;  %v159_v30 = vld [vmem:[%s1952_s4 + $0xd8] sm:$0xff] }
   0xb   :  { %203 = vperm.xlu1 %1252, %v135_v5   ;;  %193 = vperm.xlu0 %1251, %v133_v6   ;;  %v164_v31 = vld [vmem:[%s1952_s4 + $0x100] sm:$0xff]  ;;  %v163_v32 = vld [vmem:[%s1952_s4 + $0xf8] sm:$0xff]  ;;  %v162_v33 = vld [vmem:[%s1952_s4 + $0xf0] sm:$0xff] }
   0xc   :  { %v167_v34 = vld [vmem:[%s1952_s4 + $0x118] sm:$0xff]  ;;  %v166_v35 = vld [vmem:[%s1952_s4 + $0x110] sm:$0xff]  ;;  %v165_v36 = vld [vmem:[%s1952_s4 + $0x108] sm:$0xff] }
   0xd   :  { %v170_v38 = vld [vmem:[%s1952_s4 + $0x130] sm:$0xff]  ;;  %v169_v39 = vld [vmem:[%s1952_s4 + $0x128] sm:$0xff]  ;;  %v168_v40 = vld [vmem:[%s1952_s4 + $0x120] sm:$0xff] }
   0xe   :  { %v173_v42 = vld [vmem:[%s1952_s4 + $0x148] sm:$0xff]  ;;  %v172_v43 = vld [vmem:[%s1952_s4 + $0x140] sm:$0xff]  ;;  %v171_v44 = vld [vmem:[%s1952_s4 + $0x138] sm:$0xff] }
   0xf   :  { %v176_v46 = vld [vmem:[%s1952_s4 + $0x160] sm:$0xff]  ;;  %v175_v47 = vld [vmem:[%s1952_s4 + $0x158] sm:$0xff]  ;;  %v174_v48 = vld [vmem:[%s1952_s4 + $0x150] sm:$0xff] }
  0x10   :  { %v179_v52 = vld [vmem:[%s1952_s4 + $0x178] sm:$0xff]  ;;  %v178_v53 = vld [vmem:[%s1952_s4 + $0x170] sm:$0xff]  ;;  %v177_v54 = vld [vmem:[%s1952_s4 + $0x168] sm:$0xff] }
  0x11   :  { %v182_v58 = vld [vmem:[%s1952_s4 + $0x190] sm:$0xff]  ;;  %v181_v59 = vld [vmem:[%s1952_s4 + $0x188] sm:$0xff]  ;;  %v180_v60 = vld [vmem:[%s1952_s4 + $0x180] sm:$0xff] }
  0x12   :  { %228 = vperm.xlu2 %1253, %v140_v7   ;;  %v185_v0 = vld [vmem:[%s1952_s4 + $0x1a8] sm:$0xff]  ;;  %v184_v1 = vld [vmem:[%s1952_s4 + $0x1a0] sm:$0xff]  ;;  %v183_v2 = vld [vmem:[%s1952_s4 + $0x198] sm:$0xff] }
  0x13   :  { %223 = vperm.xlu1 %1252, %v139_v8   ;;  %218 = vperm.xlu0 %1251, %v138_v9   ;;  %v512_v6 = vld [vmem:[%s1953_s5 + $0x10] sm:$0xff]  ;;  %v511_v7 = vld [vmem:[%s1953_s5 + $0x8] sm:$0xff]  ;;  %v510_v8 = vld [vmem:[%s1953_s5] sm:$0xff] }
  0x1a   :  { %243 = vperm.xlu2 %1253, %v143_v10  }
  0x1b   :  { %238 = vperm.xlu1 %1252, %v142_v11   ;;  %233 = vperm.xlu0 %1251, %v141_v12   ;;  %v515_v12 = vld [vmem:[%s1953_s5 + $0x28] sm:$0xff] }
  0x22   :  { %258 = vperm.xlu2 %1253, %v146_v13   ;;  %v514_v13 = vld [vmem:[%s1953_s5 + $0x20] sm:$0xff] }
  0x23   :  { %253 = vperm.xlu1 %1252, %v145_v14   ;;  %248 = vperm.xlu0 %1251, %v144_v15   ;;  %v513_v14 = vld [vmem:[%s1953_s5 + $0x18] sm:$0xff] }
  0x2a   :  { %273 = vperm.xlu2 %1253, %v149_v16  }
  0x2b   :  { %268 = vperm.xlu1 %1252, %v148_v17   ;;  %263 = vperm.xlu0 %1251, %v147_v18   ;;  %v518_v18 = vld [vmem:[%s1953_s5 + $0x40] sm:$0xff] }
  0x32   :  { %288 = vperm.xlu2 %1253, %v152_v19   ;;  %v517_v19 = vld [vmem:[%s1953_s5 + $0x38] sm:$0xff] }
  0x33   :  { %283 = vperm.xlu1 %1252, %v151_v20   ;;  %278 = vperm.xlu0 %1251, %v150_v21   ;;  %v516_v20 = vld [vmem:[%s1953_s5 + $0x30] sm:$0xff] }
  0x3a   :  { %303 = vperm.xlu2 %1253, %v155_v22  }
  0x3b   :  { %298 = vperm.xlu1 %1252, %v154_v23   ;;  %293 = vperm.xlu0 %1251, %v153_v24   ;;  %v521_v24 = vld [vmem:[%s1953_s5 + $0x58] sm:$0xff] }
  0x42   :  { %318 = vperm.xlu2 %1253, %v158_v25   ;;  %v520_v25 = vld [vmem:[%s1953_s5 + $0x50] sm:$0xff] }
  0x43   :  { %313 = vperm.xlu1 %1252, %v157_v26   ;;  %308 = vperm.xlu0 %1251, %v156_v27   ;;  %v519_v26 = vld [vmem:[%s1953_s5 + $0x48] sm:$0xff] }
  0x4a   :  { %333 = vperm.xlu2 %1253, %v161_v28  }
  0x4b   :  { %328 = vperm.xlu1 %1252, %v160_v29   ;;  %323 = vperm.xlu0 %1251, %v159_v30   ;;  %v524_v30 = vld [vmem:[%s1953_s5 + $0x70] sm:$0xff] }
  0x52   :  { %348 = vperm.xlu2 %1253, %v164_v31   ;;  %v523_v31 = vld [vmem:[%s1953_s5 + $0x68] sm:$0xff] }
  0x53   :  { %343 = vperm.xlu1 %1252, %v163_v32   ;;  %338 = vperm.xlu0 %1251, %v162_v33   ;;  %v522_v32 = vld [vmem:[%s1953_s5 + $0x60] sm:$0xff] }
  0x5a   :  { %363 = vperm.xlu2 %1253, %v167_v34  }
  0x5b   :  { %358 = vperm.xlu1 %1252, %v166_v35   ;;  %353 = vperm.xlu0 %1251, %v165_v36   ;;  %v527_v36 = vld [vmem:[%s1953_s5 + $0x88] sm:$0xff] }
  0x5c   :  { %v1398_v37 = vpop.permute.xlu2 %208 }
  0x62   :  { %378 = vperm.xlu2 %1253, %v170_v38   ;;  %v526_v38 = vld [vmem:[%s1953_s5 + $0x80] sm:$0xff] }
  0x63   :  { %373 = vperm.xlu1 %1252, %v169_v39   ;;  %368 = vperm.xlu0 %1251, %v168_v40   ;;  %v525_v39 = vld [vmem:[%s1953_s5 + $0x78] sm:$0xff] }
  0x64   :  { %v1409_v41 = vpop.permute.xlu2 %213 }
  0x6a   :  { %393 = vperm.xlu2 %1253, %v173_v42  }
  0x6b   :  { %388 = vperm.xlu1 %1252, %v172_v43   ;;  %383 = vperm.xlu0 %1251, %v171_v44   ;;  %v556_v44 = vld [vmem:[%s1953_s5 + $0x170] sm:$0xff] }
  0x6c   :  { %v1420_v45 = vpop.permute.xlu2 %228 }
  0x72   :  { %408 = vperm.xlu2 %1253, %v176_v46   ;;  %v529_v46 = vld [vmem:[%s1953_s5 + $0x98] sm:$0xff] }
  0x73   :  { %403 = vperm.xlu1 %1252, %v175_v47   ;;  %398 = vperm.xlu0 %1251, %v174_v48   ;;  %v528_v47 = vld [vmem:[%s1953_s5 + $0x90] sm:$0xff] }
  0x74   :  { %v1431_v49 = vpop.permute.xlu2 %243 }
  0x75   :  { %v1433_v50 = vpop.permute.xlu1 %198  ;;  %v1435_v51 = vpop.permute.xlu0 %188 }
  0x7a   :  { %423 = vperm.xlu2 %1253, %v179_v52  }
  0x7b   :  { %418 = vperm.xlu1 %1252, %v178_v53   ;;  %413 = vperm.xlu0 %1251, %v177_v54   ;;  %v541_v54 = vld [vmem:[%s1953_s5 + $0xf8] sm:$0xff] }
  0x7c   :  { %v1446_v55 = vpop.permute.xlu2 %258 }
  0x7d   :  { %v1448_v56 = vpop.permute.xlu1 %203  ;;  %v1450_v57 = vpop.permute.xlu0 %193 }
  0x82   :  { %438 = vperm.xlu2 %1253, %v182_v58   ;;  %v540_v58 = vld [vmem:[%s1953_s5 + $0xf0] sm:$0xff] }
  0x83   :  { %433 = vperm.xlu1 %1252, %v181_v59   ;;  %428 = vperm.xlu0 %1251, %v180_v60   ;;  %v557_v59 = vld [vmem:[%s1953_s5 + $0x178] sm:$0xff] }
  0x84   :  { %v1461_v61 = vpop.permute.xlu2 %273 }
  0x85   :  { %v1463_v62 = vpop.permute.xlu1 %223  ;;  %v1465_v63 = vpop.permute.xlu0 %218 }
  0x8a   :  { %453 = vperm.xlu2 %1253, %v185_v0  }
  0x8b   :  { %448 = vperm.xlu1 %1252, %v184_v1   ;;  %443 = vperm.xlu0 %1251, %v183_v2   ;;  %v538_v2 = vld [vmem:[%s1953_s5 + $0xe0] sm:$0xff] }
  0x8c   :  { %v1476_v3 = vpop.permute.xlu2 %288 }
  0x8d   :  { %1959 = vst [vmem:[#allocation2_spill] sm:$0xff] %v1476_v3  ;;  %v1478_v4 = vpop.permute.xlu1 %238  ;;  %v1480_v5 = vpop.permute.xlu0 %233  ;;  %v559_v3 = vld [vmem:[%s1953_s5 + $0x188] sm:$0xff] }
  0x92   :  { %576 = vperm.xlu2 %1253, %v512_v6   ;;  %v555_v6 = vld [vmem:[%s1953_s5 + $0x168] sm:$0xff] }
  0x93   :  { %571 = vperm.xlu1 %1252, %v511_v7   ;;  %566 = vperm.xlu0 %1251, %v510_v8   ;;  %v554_v7 = vld [vmem:[%s1953_s5 + $0x160] sm:$0xff] }
  0x94   :  { %v1491_v9 = vpop.permute.xlu2 %303 }
  0x95   :  { %v1493_v10 = vpop.permute.xlu1 %253  ;;  %v1495_v11 = vpop.permute.xlu0 %248 }
  0x9a   :  { %591 = vperm.xlu2 %1253, %v515_v12  }
  0x9b   :  { %586 = vperm.xlu1 %1252, %v514_v13   ;;  %581 = vperm.xlu0 %1251, %v513_v14   ;;  %v553_v14 = vld [vmem:[%s1953_s5 + $0x158] sm:$0xff] }
  0x9c   :  { %v1506_v15 = vpop.permute.xlu2 %318 }
  0x9d   :  { %v1508_v16 = vpop.permute.xlu1 %268  ;;  %v1510_v17 = vpop.permute.xlu0 %263 }
  0xa2   :  { %606 = vperm.xlu2 %1253, %v518_v18   ;;  %v552_v18 = vld [vmem:[%s1953_s5 + $0x150] sm:$0xff] }
  0xa3   :  { %601 = vperm.xlu1 %1252, %v517_v19   ;;  %596 = vperm.xlu0 %1251, %v516_v20   ;;  %v539_v19 = vld [vmem:[%s1953_s5 + $0xe8] sm:$0xff] }
  0xa4   :  { %v1521_v21 = vpop.permute.xlu2 %333 }
  0xa5   :  { %v1523_v22 = vpop.permute.xlu1 %283  ;;  %v1525_v23 = vpop.permute.xlu0 %278 }
  0xaa   :  { %621 = vperm.xlu2 %1253, %v521_v24  }
  0xab   :  { %616 = vperm.xlu1 %1252, %v520_v25   ;;  %611 = vperm.xlu0 %1251, %v519_v26   ;;  %v550_v26 = vld [vmem:[%s1953_s5 + $0x140] sm:$0xff] }
  0xac   :  { %v1536_v27 = vpop.permute.xlu2 %348 }
  0xad   :  { %1960 = vst [vmem:[#allocation3_spill] sm:$0xff] %v1536_v27  ;;  %v1538_v28 = vpop.permute.xlu1 %298  ;;  %v1540_v29 = vpop.permute.xlu0 %293 }
  0xae   :  { %1961 = vst [vmem:[#allocation4_spill] sm:$0xff] %v1540_v29 }
  0xb2   :  { %636 = vperm.xlu2 %1253, %v524_v30   ;;  %v537_v30 = vld [vmem:[%s1953_s5 + $0xd8] sm:$0xff] }
  0xb3   :  { %631 = vperm.xlu1 %1252, %v523_v31   ;;  %626 = vperm.xlu0 %1251, %v522_v32   ;;  %v536_v31 = vld [vmem:[%s1953_s5 + $0xd0] sm:$0xff]  ;;  %v1644_v32 = vld [vmem:[%s1954_s1 + $0x8] sm:$0xff]  }
  0xb4   :  { %v1551_v33 = vpop.permute.xlu2 %363 }
  0xb5   :  { %1962 = vst [vmem:[#allocation5_spill] sm:$0xff] %v1551_v33  ;;  %v1553_v34 = vpop.permute.xlu1 %313  ;;  %v1555_v35 = vpop.permute.xlu0 %308  ;;  %v1118_v33 = vunpack.c.h.bf16 %v1644_v32 }
  0xba   :  { %651 = vperm.xlu2 %1253, %v527_v36  }
  0xbb   :  { %646 = vperm.xlu1 %1252, %v526_v38   ;;  %641 = vperm.xlu0 %1251, %v525_v39  }
  0xbc   :  { %v1566_v40 = vpop.permute.xlu2 %378 }
  0xbd   :  { %v1568_v42 = vpop.permute.xlu1 %328  ;;  %v1570_v43 = vpop.permute.xlu0 %323 }
  0xc2   :  { %796 = vperm.xlu2 %1253, %v556_v44   ;;  %v1117_v44 = vunpack.c.l.bf16 %v1644_v32  ;;  %v1226_v32 = vld [vmem:[%s1954_s1 + $0x18] sm:$0xff]  }
  0xc3   :  { %661 = vperm.xlu1 %1252, %v529_v46   ;;  %656 = vperm.xlu0 %1251, %v528_v47   ;;  %v535_v46 = vld [vmem:[%s1953_s5 + $0xc8] sm:$0xff]  ;;  %v534_v47 = vld [vmem:[%s1953_s5 + $0xc0] sm:$0xff] }
  0xc4   :  { %v1581_v48 = vpop.permute.xlu2 %393 }
  0xc5   :  { %v1583_v52 = vpop.permute.xlu1 %343  ;;  %v1585_v53 = vpop.permute.xlu0 %338 }
  0xca   :  { %721 = vperm.xlu2 %1253, %v541_v54   ;;  %v551_v54 = vld [vmem:[%s1953_s5 + $0x148] sm:$0xff] }
  0xcb   :  { %716 = vperm.xlu1 %1252, %v540_v58   ;;  %801 = vperm.xlu0 %1251, %v557_v59   ;;  %v458_v58 = vmul.f32 %v1117_v44, %v1433_v50  ;;  %v548_v50 = vld [vmem:[%s1953_s5 + $0x130] sm:$0xff]  ;;  %v546_v44 = vld [vmem:[%s1953_s5 + $0x120] sm:$0xff] }
  0xcc   :  { %v1596_v60 = vpop.permute.xlu2 %408 }
  0xcd   :  { %v1598_v0 = vpop.permute.xlu1 %358  ;;  %v1600_v1 = vpop.permute.xlu0 %353 }
  0xce   :  { %1963 = vst [vmem:[#allocation6_spill] sm:$0xff] %v1598_v0 }
  0xcf   :  { %1964 = vst [vmem:[#allocation7_spill] sm:$0xff] %v1600_v1 }
  0xd2   :  { %706 = vperm.xlu2 %1253, %v538_v2  }
  0xd3   :  { %791 = vperm.xlu1 %1252, %v555_v6   ;;  %786 = vperm.xlu0 %1251, %v554_v7  }
  0xd4   :  { %v1611_v8 = vpop.permute.xlu2 %423 }
  0xd5   :  { %v1613_v12 = vpop.permute.xlu1 %373  ;;  %v1615_v13 = vpop.permute.xlu0 %368 }
  0xda   :  { %781 = vperm.xlu2 %1253, %v553_v14   ;;  %v532_v14 = vld [vmem:[%s1953_s5 + $0xb0] sm:$0xff] }
  0xdb   :  { %776 = vperm.xlu1 %1252, %v552_v18   ;;  %711 = vperm.xlu0 %1251, %v539_v19   ;;  %v549_v18 = vld [vmem:[%s1953_s5 + $0x138] sm:$0xff] }
  0xdc   :  { %v1626_v20 = vpop.permute.xlu2 %438 }
  0xdd   :  { %1965 = vst [vmem:[#allocation8_spill] sm:$0xff] %v1626_v20  ;;  %v1628_v24 = vpop.permute.xlu1 %388  ;;  %v1630_v25 = vpop.permute.xlu0 %383 }
  0xe2   :  { %766 = vperm.xlu2 %1253, %v550_v26  }
  0xe3   :  { %701 = vperm.xlu1 %1252, %v537_v30   ;;  %696 = vperm.xlu0 %1251, %v536_v31   ;;  %v547_v31 = vld [vmem:[%s1953_s5 + $0x128] sm:$0xff] }
  0xe4   :  { %v1646_v36 = vpop.permute.xlu2 %453 }
  0xe5   :  { %v1648_v38 = vpop.permute.xlu1 %403  ;;  %v1650_v39 = vpop.permute.xlu0 %398 }
  0xea   :  { %691 = vperm.xlu2 %1253, %v535_v46   ;;  %v533_v46 = vld [vmem:[%s1953_s5 + $0xb8] sm:$0xff] }
  0xeb   :  { %686 = vperm.xlu1 %1252, %v534_v47   ;;  %771 = vperm.xlu0 %1251, %v551_v54   ;;  %v1112_v54 = vld [vmem:[%s1954_s1] sm:$0xff]  }
  0xec   :  { %v577_v59 = vpop.permute.xlu2 %576 }
  0xed   :  { %v1663_v2 = vadd.f32 %v577_v59, %v458_v58  ;;  %v1665_v6 = vpop.permute.xlu1 %418  ;;  %v1667_v7 = vpop.permute.xlu0 %413 }
  0xf2   :  { %676 = vperm.xlu2 %1253, %v532_v14   ;;  %v530_v14 = vld [vmem:[%s1953_s5 + $0xa0] sm:$0xff] }
  0xf3   :  { %761 = vperm.xlu1 %1252, %v549_v18   ;;  %756 = vperm.xlu0 %1251, %v548_v50   ;;  %v1113_v18 = vunpack.c.l.bf16 %v1112_v54  ;;  %v1114_v50 = vunpack.c.h.bf16 %v1112_v54 }
  0xf4   :  { %v592_v19 = vpop.permute.xlu2 %591 }
  0xf5   :  { %v1678_v26 = vpop.permute.xlu1 %433  ;;  %v1680_v30 = vpop.permute.xlu0 %428  ;;  %v457_v1 = vmul.f32 %v1114_v50, %v1450_v57  ;;  %v531_v57 = vld [vmem:[%s1953_s5 + $0xa8] sm:$0xff] }
  0xf6   :  { %1966 = vst [vmem:[#allocation9_spill] sm:$0xff] %v1678_v26 }
  0xf7   :  { %1967 = vst [vmem:[#allocation10_spill] sm:$0xff] %v1680_v30  ;;  %v456_v30 = vmul.f32 %v1113_v18, %v1435_v51  ;;  %v544_v51 = vld [vmem:[%s1953_s5 + $0x110] sm:$0xff] }
  0xfa   :  { %751 = vperm.xlu2 %1253, %v547_v31   ;;  %v563_v31 = vld [vmem:[%s1953_s5 + $0x1a8] sm:$0xff] }
  0xfb   :  { %746 = vperm.xlu1 %1252, %v546_v44   ;;  %681 = vperm.xlu0 %1251, %v533_v46   ;;  %v562_v44 = vld [vmem:[%s1953_s5 + $0x1a0] sm:$0xff]  ;;  %v1225_v46 = vld [vmem:[%s1954_s1 + $0x10] sm:$0xff]  }
  0xfc   :  { %v1691_v47 = vpop.permute.xlu2 %606  ;;  %v1121_v29 = vunpack.c.l.bf16 %v1225_v46 }
  0xfd   :  { %v1696_v58 = vpop.permute.xlu1 %448  ;;  %v1698_v59 = vpop.permute.xlu0 %443 }
  0xfe   :  { %1968 = vst [vmem:[#allocation11_spill] sm:$0xff] %v1698_v59  ;;  %v1122_v59 = vunpack.c.h.bf16 %v1225_v46 }
 0x102   :  { %666 = vperm.xlu2 %1253, %v530_v14   ;;  %v545_v14 = vld [vmem:[%s1953_s5 + $0x118] sm:$0xff] }
 0x103   :  { %831 = vperm.xlu1 %1252, %v563_v31   ;;  %826 = vperm.xlu0 %1251, %v562_v44  }
 0x104   :  { %v1714_v54 = vpop.permute.xlu2 %621 }
 0x105   :  { %v572_v26 = vpop.permute.xlu1 %571  ;;  %v567_v27 = vpop.permute.xlu0 %566 }
 0x106   :  { %v835_v20 = vadd.f32 %v572_v26, %v457_v1  ;;  %v834_v0 = vadd.f32 %v567_v27, %v456_v30  ;;  %v461_v1 = vmul.f32 %v1122_v59, %v1409_v41  ;;  %v460_v26 = vmul.f32 %v1121_v29, %v1398_v37 }
 0x107   :  { %v1126_v29 = vunpack.c.h.bf16 %v1226_v32 }
 0x108   :  { %v889_v31 = vmax.f32 %v835_v20, 0.0  ;;  %v888_v44 = vmax.f32 %v834_v0, 0.0  ;;  %v459_v20 = vmul.f32 %v1118_v33, %v1448_v56  ;;  %v1734_v0 = vld [vmem:[%s1954_s1 + $0x40] sm:$0xff]   ;;  %v839_v30 = vadd.f32 %v592_v19, %v461_v1  ;;  %v561_v19 = vld [vmem:[%s1953_s5 + $0x198] sm:$0xff] }
 0x109   :  { %v1146_v37 = vunpack.c.h.bf16 %v1734_v0  ;;  %v1125_v56 = vunpack.c.l.bf16 %v1226_v32  ;;  %v542_v33 = vld [vmem:[%s1953_s5 + $0x100] sm:$0xff] }
 0x10a   :  { %741 = vperm.xlu2 %1253, %v545_v14   ;;  %v1727_v27 = vpack.c.bf16 %v889_v31, %v888_v44  ;;  %v890_v14 = vmax.f32 %v1663_v2, 0.0  ;;  %v893_v31 = vmax.f32 %v839_v30, 0.0  ;;  %v1227_v2 = vld [vmem:[%s1954_s1 + $0x20] sm:$0xff]   ;;  %v463_v30 = vmul.f32 %v1126_v29, %v1463_v62 }
 0x10b   :  { %736 = vperm.xlu1 %1252, %v544_v51   ;;  %671 = vperm.xlu0 %1251, %v531_v57   ;;  %v560_v57 = vld [vmem:[%s1953_s5 + $0x190] sm:$0xff]  ;;  %v473_v32 = vmul.f32 %v1146_v37, %v1461_v61  ;;  %v1130_v37 = vunpack.c.h.bf16 %v1227_v2  ;;  %v558_v62 = vld [vmem:[%s1953_s5 + $0x180] sm:$0xff] }
 0x10c   :  { %v1739_v41 = vpop.permute.xlu2 %636 }
 0x10d   :  { %v587_v59 = vpop.permute.xlu1 %586  ;;  %v582_v18 = vpop.permute.xlu0 %581 }
 0x10e   :  { %v838_v50 = vadd.f32 %v587_v59, %v460_v26  ;;  %v837_v46 = vadd.f32 %v582_v18, %v459_v20  ;;  %v1228_v20 = vld [vmem:[%s1954_s1 + $0x28] sm:$0xff]   ;;  %v462_v59 = vmul.f32 %v1125_v56, %v1465_v63 }
 0x10f   :  { %v1133_v61 = vunpack.c.l.bf16 %v1228_v20  ;;  %v543_v63 = vld [vmem:[%s1953_s5 + $0x108] sm:$0xff] }
 0x110   :  { %v892_v44 = vmax.f32 %v838_v50, 0.0  ;;  %v891_v51 = vmax.f32 %v837_v46, 0.0 }
 0x112   :  { %726 = vperm.xlu2 %1253, %v542_v33   ;;  %v1752_v1 = vpack.c.bf16 %v893_v31, %v892_v44  ;;  %v1754_v26 = vpack.c.bf16 %v891_v51, %v890_v14  ;;  %v1129_v14 = vunpack.c.l.bf16 %v1227_v2  ;;  %v1134_v31 = vunpack.c.h.bf16 %v1228_v20 }
 0x113   :  { %821 = vperm.xlu1 %1252, %v561_v19   ;;  %816 = vperm.xlu0 %1251, %v560_v57   ;;  %v466_v2 = vmul.f32 %v1133_v61, %v1478_v4  ;;  %v465_v20 = vmul.f32 %v1130_v37, %v1480_v5  ;;  %v1066_v4 = vld [vmem:[%s1955_s3] sm:$0xff] }
 0x114   :  { %v652_v18 = vpop.permute.xlu2 %651  ;;  %v464_v29 = vmul.f32 %v1129_v14, %v1420_v45  ;;  %v467_v56 = vmul.f32 %v1134_v31, %v1431_v49 }
 0x115   :  { %v1765_v50 = vadd.f32 %v652_v18, %v473_v32  ;;  %v602_v46 = vpop.permute.xlu1 %601  ;;  %v597_v33 = vpop.permute.xlu0 %596 }
 0x116   :  { %v841_v44 = vadd.f32 %v602_v46, %v463_v30  ;;  %v840_v51 = vadd.f32 %v597_v33, %v462_v59  ;;  %v1229_v30 = vld [vmem:[%s1954_s1 + $0x30] sm:$0xff]   ;;  %v842_v59 = vadd.f32 %v1691_v47, %v464_v29  ;;  %v845_v18 = vadd.f32 %v1714_v54, %v467_v56  ;;  %v1053_v47 = vld [vmem:[%s1956_s2 + $0x8] sm:$0xff]  ;;  %v1052_v54 = vld [vmem:[%s1956_s2] sm:$0xff] }
 0x117   :  { %v1138_v14 = vunpack.c.h.bf16 %v1229_v30  ;;  %v1137_v31 = vunpack.c.l.bf16 %v1229_v30 }
 0x118   :  { %v895_v19 = vmax.f32 %v841_v44, 0.0  ;;  %v894_v57 = vmax.f32 %v840_v51, 0.0  ;;  %v896_v5 = vmax.f32 %v842_v59, 0.0  ;;  %v899_v44 = vmax.f32 %v845_v18, 0.0 }
 0x119   :  { %v1145_v18 = vunpack.c.l.bf16 %v1734_v0 }
 0x11a   :  { %811 = vperm.xlu2 %1253, %v559_v3   ;;  %v1778_v32 = vpack.c.bf16 %v895_v19, %v894_v57  ;;  %v1230_v57 = vld [vmem:[%s1954_s1 + $0x38] sm:$0xff]  }
 0x11b   :  { %806 = vperm.xlu1 %1252, %v558_v62   ;;  %731 = vperm.xlu0 %1251, %v543_v63   ;;  %v469_v62 = vmul.f32 %v1138_v14, %v1493_v10  ;;  %v468_v63 = vmul.f32 %v1137_v31, %v1495_v11  ;;  %v472_v11 = vmul.f32 %v1145_v18, %v1508_v16  ;;  %v1232_v31 = vld [vmem:[%s1954_s1 + $0x48] sm:$0xff]  }
 0x11c   :  { %v1787_v45 = vpop.permute.xlu2 %796 }
 0x11d   :  { %v617_v49 = vpop.permute.xlu1 %616  ;;  %v612_v3 = vpop.permute.xlu0 %611 }
 0x11e   :  { %v844_v46 = vadd.f32 %v617_v49, %v466_v2  ;;  %v843_v33 = vadd.f32 %v612_v3, %v465_v20  ;;  %v1141_v20 = vunpack.c.l.bf16 %v1230_v57  ;;  %v1142_v49 = vunpack.c.h.bf16 %v1230_v57 }
 0x120   :  { %v898_v51 = vmax.f32 %v844_v46, 0.0  ;;  %v897_v61 = vmax.f32 %v843_v33, 0.0  ;;  %v1067_v33 = vld [vmem:[%s1955_s3 + $0x8] sm:$0xff]  ;;  %v471_v14 = vmul.f32 %v1142_v49, %v1510_v17 }
 0x122   :  { %1070 = vperm.xlu2 %1253, %v1066_v4   ;;  %v1798_v37 = vpack.c.bf16 %v899_v44, %v898_v51  ;;  %v1800_v19 = vpack.c.bf16 %v897_v61, %v896_v5  ;;  %v470_v4 = vmul.f32 %v1141_v20, %v1446_v55  ;;  %v1149_v55 = vunpack.c.l.bf16 %v1232_v31 }
 0x123   :  { %1061 = vperm.xlu1 %1252, %v1053_v47   ;;  %1056 = vperm.xlu0 %1251, %v1052_v54   ;;  %v1150_v54 = vunpack.c.h.bf16 %v1232_v31 }
 0x124   :  { %v722_v29 = vpop.permute.xlu2 %721  ;;  %v848_v0 = vadd.f32 %v1739_v41, %v470_v4  ;;  %v1238_v41 = vld [vmem:[%s1954_s1 + $0x78] sm:$0xff]   ;;  %v474_v20 = vmul.f32 %v1149_v55, %v1525_v23 }
 0x125   :  { %v632_v56 = vpop.permute.xlu1 %631  ;;  %v627_v2 = vpop.permute.xlu0 %626  ;;  %v1174_v18 = vunpack.c.h.bf16 %v1238_v41 }
 0x126   :  { %v847_v30 = vadd.f32 %v632_v56, %v469_v62  ;;  %v846_v59 = vadd.f32 %v627_v2, %v468_v63  ;;  %v902_v57 = vmax.f32 %v848_v0, 0.0  ;;  %v905_v62 = vmax.f32 %v1765_v50, 0.0 }
 0x127   :  { %v475_v2 = vmul.f32 %v1150_v54, %v1523_v22  ;;  %v487_v22 = vmul.f32 %v1174_v18, %v1583_v52 }
 0x128   :  { %v901_v3 = vmax.f32 %v847_v30, 0.0  ;;  %v900_v46 = vmax.f32 %v846_v59, 0.0  ;;  %v1246_v30 = vld [vmem:[%s1954_s1 + $0xb8] sm:$0xff]  }
 0x129   :  { %v1205_v49 = vunpack.c.l.bf16 %v1246_v30  ;;  %v1206_v4 = vunpack.c.h.bf16 %v1246_v30  ;;  %v865_v54 = vadd.f32 %v722_v29, %v487_v22 }
 0x12a   :  { %v948_v10 = vpack.c.bf16 %v901_v3, %v900_v46 }
 0x12b   :  { %1075 = vperm.xlu0 %1251, %v1067_v33   ;;  %v1173_v33 = vunpack.c.l.bf16 %v1238_v41  ;;  %v502_v23 = vmul.f32 %v1205_v49, %v1665_v6 }
 0x12c   :  { %v1818_v51 = vpop.permute.xlu2 %706 }
 0x12d   :  { %v647_v5 = vpop.permute.xlu1 %646  ;;  %v642_v44 = vpop.permute.xlu0 %641 }
 0x12e   :  { %v850_v61 = vadd.f32 %v647_v5, %v472_v11  ;;  %v849_v47 = vadd.f32 %v642_v44, %v471_v14  ;;  %v486_v5 = vmul.f32 %v1173_v33, %v1585_v53  ;;  %v1245_v44 = vld [vmem:[%s1954_s1 + $0xb0] sm:$0xff]  }
 0x12f   :  { %v1201_v6 = vunpack.c.l.bf16 %v1245_v44 }
 0x130   :  { %v904_v16 = vmax.f32 %v850_v61, 0.0  ;;  %v903_v63 = vmax.f32 %v849_v47, 0.0  ;;  %v503_v61 = vmul.f32 %v1206_v4, %v1611_v8  ;;  %v880_v47 = vadd.f32 %v1787_v45, %v502_v23  ;;  %v1244_v45 = vld [vmem:[%s1954_s1 + $0xa8] sm:$0xff]  }
 0x131   :  { %v500_v29 = vmul.f32 %v1201_v6, %v1596_v60  ;;  %v1243_v6 = vld [vmem:[%s1954_s1 + $0xa0] sm:$0xff]  }
 0x132   :  { %v949_v17 = vpack.c.bf16 %v903_v63, %v902_v57  ;;  %v1821_v56 = vpack.c.bf16 %v905_v62, %v904_v16  ;;  %v1202_v62 = vunpack.c.h.bf16 %v1245_v44  ;;  %v934_v16 = vmax.f32 %v880_v47, 0.0 }
 0x133   :  { %v919_v63 = vmax.f32 %v865_v54, 0.0 }
 0x134   :  { %996 = vmatpush.bf16.msra.mxu0 %v949_v17  ;;  %v782_v11 = vpop.permute.xlu2 %781 }
 0x135   :  { %v662_v59 = vpop.permute.xlu1 %661  ;;  %v657_v50 = vpop.permute.xlu0 %656 }
 0x136   :  { %v853_v3 = vadd.f32 %v662_v59, %v475_v2  ;;  %v852_v46 = vadd.f32 %v657_v50, %v474_v20  ;;  %v501_v20 = vmul.f32 %v1202_v62, %v1667_v7  ;;  %v1198_v50 = vunpack.c.h.bf16 %v1244_v45 }
 0x138   :  { %v907_v14 = vmax.f32 %v853_v3, 0.0  ;;  %v906_v31 = vmax.f32 %v852_v46, 0.0  ;;  %997 = vmatpush.bf16.msra.mxu0 %v948_v10  ;;  %v1197_v46 = vunpack.c.l.bf16 %v1244_v45  ;;  %v499_v7 = vmul.f32 %v1198_v50, %v1648_v38 }
 0x139   :  { %v1194_v45 = vunpack.c.h.bf16 %v1243_v6 }
 0x13a   :  { %v1833_v0 = vpack.c.bf16 %v907_v14, %v906_v31  ;;  %v1236_v31 = vld [vmem:[%s1954_s1 + $0x68] sm:$0xff]   ;;  %v498_v22 = vmul.f32 %v1197_v46, %v1650_v39 }
 0x13b   :  { %v1165_v47 = vunpack.c.l.bf16 %v1236_v31  ;;  %v1166_v54 = vunpack.c.h.bf16 %v1236_v31 }
 0x13c   :  { %998 = vmatpush.bf16.msra.mxu0 %v1798_v37  ;;  %v1843_v41 = vpop.permute.xlu2 %766  ;;  %v1237_v37 = vld [vmem:[%s1954_s1 + $0x70] sm:$0xff]  }
 0x13d   :  { %v717_v10 = vpop.permute.xlu1 %716  ;;  %v802_v55 = vpop.permute.xlu0 %801  ;;  %v1169_v59 = vunpack.c.l.bf16 %v1237_v37  ;;  %v1170_v3 = vunpack.c.h.bf16 %v1237_v37 }
 0x13e   :  { %v864_v52 = vadd.f32 %v717_v10, %v486_v5  ;;  %v881_v57 = vadd.f32 %v802_v55, %v503_v61  ;;  %v877_v5 = vadd.f32 %v782_v11, %v499_v7  ;;  %v483_v11 = vmul.f32 %v1166_v54, %v1570_v43 }
 0x13f   :  { %v484_v60 = vmul.f32 %v1169_v59, %v1568_v42  ;;  %v497_v59 = vmul.f32 %v1194_v45, %v1581_v48 }
 0x140   :  { %v918_v53 = vmax.f32 %v864_v52, 0.0  ;;  %v935_v17 = vmax.f32 %v881_v57, 0.0  ;;  %999 = vmatpush.bf16.msra.mxu0 %v1800_v19  ;;  %v931_v10 = vmax.f32 %v877_v5, 0.0 }
 0x141   :  { %v862_v23 = vadd.f32 %v1818_v51, %v484_v60  ;;  %v1235_v51 = vld [vmem:[%s1954_s1 + $0x60] sm:$0xff]  }
 0x142   :  { %v957_v8 = vpack.c.bf16 %v919_v63, %v918_v53  ;;  %v965_v2 = vpack.c.bf16 %v935_v17, %v934_v16  ;;  %v1162_v63 = vunpack.c.h.bf16 %v1235_v51 }
 0x144   :  { %1000 = vmatpush.bf16.msra.mxu0 %v1778_v32  ;;  %1010 = vmatpush.bf16.msra.mxu1 %v957_v8  ;;  %v485_v32 = vmul.f32 %v1170_v3, %v1521_v21  ;;  %v692_v44 = vpop.permute.xlu2 %691  ;;  %v916_v21 = vmax.f32 %v862_v23, 0.0 }
 0x145   :  { %1024 = vmatpush.bf16.msra.mxu2 %v965_v2  ;;  %v792_v19 = vpop.permute.xlu1 %791  ;;  %v787_v30 = vpop.permute.xlu0 %786  ;;  %v1161_v2 = vunpack.c.l.bf16 %v1235_v51 }
 0x146   :  { %v879_v18 = vadd.f32 %v792_v19, %v501_v20  ;;  %v878_v49 = vadd.f32 %v787_v30, %v500_v29  ;;  %v1242_v30 = vld [vmem:[%s1954_s1 + $0x98] sm:$0xff]  }
 0x147   :  { %v480_v19 = vmul.f32 %v1161_v2, %v1555_v35 }
 0x148   :  { %v933_v33 = vmax.f32 %v879_v18, 0.0  ;;  %v932_v4 = vmax.f32 %v878_v49, 0.0  ;;  %1001 = vmatpush.bf16.msra.mxu0 %v1752_v1 }
 0x14a   :  { %v964_v14 = vpack.c.bf16 %v933_v33, %v932_v4  ;;  %v1190_v4 = vunpack.c.h.bf16 %v1242_v30 }
 0x14c   :  { %1002 = vmatpush.bf16.msra.mxu0 %v1754_v26  ;;  %1025 = vmatpush.bf16.msra.mxu2 %v964_v14  ;;  %v482_v26 = vmul.f32 %v1165_v47, %v1506_v15  ;;  %v677_v53 = vpop.permute.xlu2 %676  ;;  %v481_v15 = vmul.f32 %v1162_v63, %v1553_v34  ;;  %v1189_v34 = vunpack.c.l.bf16 %v1242_v30  ;;  %v495_v23 = vmul.f32 %v1190_v4, %v1630_v25 }
 0x14d   :  { %v777_v1 = vpop.permute.xlu1 %776  ;;  %v712_v42 = vpop.permute.xlu0 %711 }
 0x14e   :  { %v876_v61 = vadd.f32 %v777_v1, %v498_v22  ;;  %v863_v38 = vadd.f32 %v712_v42, %v485_v32  ;;  %v859_v18 = vadd.f32 %v692_v44, %v481_v15  ;;  %v1241_v32 = vld [vmem:[%s1954_s1 + $0x90] sm:$0xff]   ;;  %v494_v22 = vmul.f32 %v1189_v34, %v1566_v40  ;;  %v1240_v15 = vld [vmem:[%s1954_s1 + $0x88] sm:$0xff]  }
 0x14f   :  { %v1186_v44 = vunpack.c.h.bf16 %v1241_v32  ;;  %v1185_v54 = vunpack.c.l.bf16 %v1241_v32  ;;  %v1972_v32 = vld [vmem:[#allocation6_spill] sm:$0xff] }
 0x150   :  { %v930_v55 = vmax.f32 %v876_v61, 0.0  ;;  %v917_v52 = vmax.f32 %v863_v38, 0.0  ;;  %1003 = vmatpush.bf16.msra.mxu0 %v1727_v27  ;;  %v1193_v27 = vunpack.c.l.bf16 %v1243_v6  ;;  %v913_v60 = vmax.f32 %v859_v18, 0.0 }
 0x151   :  { %v1182_v18 = vunpack.c.h.bf16 %v1240_v15 }
 0x152   :  { %v956_v39 = vpack.c.bf16 %v917_v52, %v916_v21  ;;  %v963_v57 = vpack.c.bf16 %v931_v10, %v930_v55  ;;  %v496_v43 = vmul.f32 %v1193_v27, %v1628_v24  ;;  %v493_v52 = vmul.f32 %v1186_v44, %v1613_v12 }
 0x154   :  { %1011 = vmatpush.bf16.msra.mxu1 %v956_v39  ;;  %1026 = vmatpush.bf16.msra.mxu2 %v963_v57  ;;  %v874_v50 = vadd.f32 %v1843_v41, %v496_v43  ;;  %v752_v7 = vpop.permute.xlu2 %751  ;;  %v1234_v41 = vld [vmem:[%s1954_s1 + $0x58] sm:$0xff]  }
 0x155   :  { %v702_v62 = vpop.permute.xlu1 %701  ;;  %v697_v16 = vpop.permute.xlu0 %696  ;;  %v1157_v5 = vunpack.c.l.bf16 %v1234_v41  ;;  %v1158_v47 = vunpack.c.h.bf16 %v1234_v41  ;;  %v871_v25 = vadd.f32 %v752_v7, %v493_v52  ;;  %v1970_v7 = vld [vmem:[#allocation5_spill] sm:$0xff] }
 0x156   :  { %v861_v17 = vadd.f32 %v702_v62, %v483_v11  ;;  %v860_v8 = vadd.f32 %v697_v16, %v482_v26  ;;  %v928_v24 = vmax.f32 %v874_v50, 0.0  ;;  %v492_v26 = vmul.f32 %v1185_v54, %v1615_v13  ;;  %v1249_v11 = vld [vmem:[%s1954_s1 + $0xd0] sm:$0xff]  }
 0x157   :  { %v478_v55 = vmul.f32 %v1157_v5, %v1538_v28  ;;  %v479_v51 = vmul.f32 %v1158_v47, %v1491_v9  ;;  %v925_v27 = vmax.f32 %v871_v25, 0.0  ;;  %v1218_v12 = vunpack.c.h.bf16 %v1249_v11  ;;  %v1092_v9 = vld [vmem:[%s1957_s0] sm:$0xf]  ;;  %v1109_v13 = vld [vmem:[%s1957_s0 + $0xc] sm:$0xf0] }
 0x158   :  { %v915_v37 = vmax.f32 %v861_v17, 0.0  ;;  %v914_v29 = vmax.f32 %v860_v8, 0.0  ;;  %v1217_v17 = vunpack.c.l.bf16 %v1249_v11  ;;  %v1093_v2 = vor.u32 %v1109_v13, %v1092_v9  ;;  %v1094_v9 = vld [vmem:[%s1957_s0 + $0x10] sm:$0xf0] }
 0x159   :  { %v856_v57 = vadd.f32 %v677_v53, %v478_v55  ;;  %v509_v43 = vmul.f32 %v1218_v12, %v1646_v36 }
 0x15a   :  { %v955_v20 = vpack.c.bf16 %v915_v37, %v914_v29  ;;  %v1233_v29 = vld [vmem:[%s1954_s1 + $0x50] sm:$0xff]   ;;  %1004 = vmatmul.bf16.vlgmr.msra.gmra.mxu0 %v1093_v2  ;;  %v1975_v2 = vld [vmem:[#allocation3_spill] sm:$0xff] }
 0x15b   :  { %v910_v28 = vmax.f32 %v856_v57, 0.0  ;;  %v1153_v50 = vunpack.c.l.bf16 %v1233_v29  ;;  %v1973_v57 = vld [vmem:[#allocation8_spill] sm:$0xff] }
 0x15c   :  { %1012 = vmatpush.bf16.msra.mxu1 %v955_v20  ;;  %v667_v39 = vpop.permute.xlu2 %666  ;;  %v508_v20 = vmul.f32 %v1217_v17, %v1696_v58 }
 0x15d   :  { %v687_v49 = vpop.permute.xlu1 %686  ;;  %v772_v3 = vpop.permute.xlu0 %771 }
 0x15e   :  { %v858_v46 = vadd.f32 %v687_v49, %v480_v19  ;;  %v875_v33 = vadd.f32 %v772_v3, %v497_v59 }
 0x160   :  { %v912_v35 = vmax.f32 %v858_v46, 0.0  ;;  %v929_v14 = vmax.f32 %v875_v33, 0.0  ;;  %v1154_v46 = vunpack.c.h.bf16 %v1233_v29  ;;  %v1181_v33 = vunpack.c.l.bf16 %v1240_v15 }
 0x162   :  { %v954_v48 = vpack.c.bf16 %v913_v60, %v912_v35  ;;  %v962_v31 = vpack.c.bf16 %v929_v14, %v928_v24  ;;  %v1969_v24 = vld [vmem:[#allocation2_spill] sm:$0xff]  ;;  %v491_v35 = vmul.f32 %v1182_v18, %v1970_v7  ;;  %v1971_v14 = vld [vmem:[#allocation4_spill] sm:$0xff] }
 0x163   :  { %v476_v60 = vmul.f32 %v1153_v50, %v1969_v24  ;;  %v477_v58 = vmul.f32 %v1154_v46, %v1971_v14 }
 0x164   :  { %1013 = vmatpush.bf16.msra.mxu1 %v954_v48  ;;  %1027 = vmatpush.bf16.msra.mxu2 %v962_v31  ;;  %v742_v19 = vpop.permute.xlu2 %741  ;;  %v490_v48 = vmul.f32 %v1181_v33, %v1972_v32  ;;  %v1248_v31 = vld [vmem:[%s1954_s1 + $0xc8] sm:$0xff]  }
 0x165   :  { %v762_v1 = vpop.permute.xlu1 %761  ;;  %v757_v42 = vpop.permute.xlu0 %756  ;;  %v854_v41 = vadd.f32 %v667_v39, %v476_v60  ;;  %v1247_v39 = vld [vmem:[%s1954_s1 + $0xc0] sm:$0xff]   ;;  %v1100_v33 = vld [vmem:[%s1957_s0 + $0x8] sm:$0xf] }
 0x166   :  { %v873_v61 = vadd.f32 %v762_v1, %v495_v23  ;;  %v872_v38 = vadd.f32 %v757_v42, %v494_v22  ;;  %v869_v22 = vadd.f32 %v742_v19, %v491_v35  ;;  %v1213_v42 = vunpack.c.l.bf16 %v1248_v31  ;;  %v1102_v35 = vld [vmem:[%s1957_s0 + $0x18] sm:$0xf0] }
 0x167   :  { %v908_v47 = vmax.f32 %v854_v41, 0.0  ;;  %v1209_v12 = vunpack.c.l.bf16 %v1247_v39 }
 0x168   :  { %v927_v21 = vmax.f32 %v873_v61, 0.0  ;;  %v926_v10 = vmax.f32 %v872_v38, 0.0  ;;  %v1214_v61 = vunpack.c.h.bf16 %v1248_v31  ;;  %v923_v54 = vmax.f32 %v869_v22, 0.0 }
 0x169   :  { %v506_v25 = vmul.f32 %v1213_v42, %v1973_v57 }
 0x16a   :  { %v961_v40 = vpack.c.bf16 %v927_v21, %v926_v10 }
 0x16c   :  { %1028 = vmatpush.bf16.msra.mxu2 %v961_v40  ;;  %v727_v38 = vpop.permute.xlu2 %726  ;;  %v1239_v40 = vld [vmem:[%s1954_s1 + $0x80] sm:$0xff]  }
 0x16d   :  { %v747_v6 = vpop.permute.xlu1 %746  ;;  %v682_v62 = vpop.permute.xlu0 %681 }
 0x16e   :  { %v870_v16 = vadd.f32 %v747_v6, %v492_v26  ;;  %v857_v63 = vadd.f32 %v682_v62, %v479_v51  ;;  %v1974_v51 = vld [vmem:[#allocation11_spill] sm:$0xff]  ;;  %v1177_v62 = vunpack.c.l.bf16 %v1239_v40 }
 0x16f   :  { %v507_v26 = vmul.f32 %v1214_v61, %v1974_v51 }
 0x170   :  { %v924_v8 = vmax.f32 %v870_v16, 0.0  ;;  %v911_v53 = vmax.f32 %v857_v63, 0.0  ;;  %v1210_v16 = vunpack.c.h.bf16 %v1247_v39 }
 0x172   :  { %v953_v45 = vpack.c.bf16 %v911_v53, %v910_v28  ;;  %v960_v37 = vpack.c.bf16 %v925_v27, %v924_v8  ;;  %v1178_v27 = vunpack.c.h.bf16 %v1239_v40  ;;  %v1107_v53 = vld [vmem:[%s1957_s0 + $0x4] sm:$0xf] }
 0x173   :  { %v1097_v19 = vor.u32 %v1107_v53, %v1094_v9 }
 0x174   :  { %1014 = vmatpush.bf16.msra.mxu1 %v953_v45  ;;  %1029 = vmatpush.bf16.msra.mxu2 %v960_v37  ;;  %v812_v13 = vpop.permute.xlu2 %811  ;;  %v488_v45 = vmul.f32 %v1177_v62, %v1975_v2  ;;  %v1976_v37 = vld [vmem:[#allocation9_spill] sm:$0xff] }
 0x175   :  { %v832_v30 = vpop.permute.xlu1 %831  ;;  %v827_v59 = vpop.permute.xlu0 %826  ;;  %v505_v29 = vmul.f32 %v1210_v16, %v1976_v37 }
 0x176   :  { %v887_v49 = vadd.f32 %v832_v30, %v509_v43  ;;  %v886_v3 = vadd.f32 %v827_v59, %v508_v20  ;;  %v1977_v43 = vld [vmem:[#allocation7_spill] sm:$0xff]  ;;  %v1978_v30 = vld [vmem:[#allocation10_spill] sm:$0xff] }
 0x177   :  { %v489_v20 = vmul.f32 %v1178_v27, %v1977_v43  ;;  %v504_v59 = vmul.f32 %v1209_v12, %v1978_v30  ;;  %v883_v50 = vadd.f32 %v812_v13, %v505_v29 }
 0x178   :  { %v941_v34 = vmax.f32 %v887_v49, 0.0  ;;  %v940_v4 = vmax.f32 %v886_v3, 0.0 }
 0x17a   :  { %v968_v36 = vpack.c.bf16 %v941_v34, %v940_v4  ;;  %v1110_v34 = vld [vmem:[%s1957_s0 + $0x14] sm:$0xf0]  ;;  %v1108_v4 = vld [vmem:[%s1957_s0 + $0xc] sm:$0xf] }
 0x17b   :  { %v1105_v32 = vor.u32 %v1108_v4, %v1102_v35 }
 0x17c   :  { %1043 = vmatpush.bf16.msra.mxu3 %v968_v36 }
 0x17d   :  { %v737_v23 = vpop.permute.xlu1 %736  ;;  %v672_v5 = vpop.permute.xlu0 %671 }
 0x17e   :  { %v868_v44 = vadd.f32 %v737_v23, %v490_v48  ;;  %v855_v1 = vadd.f32 %v672_v5, %v477_v58  ;;  %v1101_v58 = vor.u32 %v1110_v34, %v1100_v33 }
 0x180   :  { %v922_v21 = vmax.f32 %v868_v44, 0.0  ;;  %v909_v10 = vmax.f32 %v855_v1, 0.0 }
 0x182   :  { %v952_v55 = vpack.c.bf16 %v909_v10, %v908_v47  ;;  %v959_v52 = vpack.c.bf16 %v923_v54, %v922_v21 }
 0x184   :  { %1015 = vmatpush.bf16.msra.mxu1 %v952_v55  ;;  %1030 = vmatpush.bf16.msra.mxu2 %v959_v52  ;;  %v1071_v52 = vpop.permute.xlu2 %1070 }
 0x185   :  { %v822_v11 = vpop.permute.xlu1 %821  ;;  %v817_v6 = vpop.permute.xlu0 %816 }
 0x186   :  { %v885_v63 = vadd.f32 %v822_v11, %v507_v26  ;;  %v884_v28 = vadd.f32 %v817_v6, %v506_v25 }
 0x188   :  { %v939_v17 = vmax.f32 %v885_v63, 0.0  ;;  %v938_v8 = vmax.f32 %v884_v28, 0.0  ;;  %1016 = vmatpush.bf16.msra.mxu1 %v1833_v0  ;;  %v866_v0 = vadd.f32 %v727_v38, %v488_v45 }
 0x18a   :  { %v967_v15 = vpack.c.bf16 %v939_v17, %v938_v8  ;;  %v920_v24 = vmax.f32 %v866_v0, 0.0 }
 0x18c   :  { %1017 = vmatpush.bf16.msra.mxu1 %v1821_v56  ;;  %1044 = vmatpush.bf16.msra.mxu3 %v967_v15  ;;  %v937_v56 = vmax.f32 %v883_v50, 0.0 }
 0x18d   :  { %v807_v18 = vpop.permute.xlu1 %806  ;;  %v732_v49 = vpop.permute.xlu0 %731 }
 0x18e   :  { %v882_v3 = vadd.f32 %v807_v18, %v504_v59  ;;  %v867_v46 = vadd.f32 %v732_v49, %v489_v20 }
 0x18f   :  { %1018 = vmatmul.bf16.vlgmr.msra.gmra.mxu1 %v1097_v19 }
 0x190   :  { %v936_v60 = vmax.f32 %v882_v3, 0.0  ;;  %v921_v7 = vmax.f32 %v867_v46, 0.0 }
 0x192   :  { %v958_v36 = vpack.c.bf16 %v921_v7, %v920_v24  ;;  %v966_v14 = vpack.c.bf16 %v937_v56, %v936_v60 }
 0x194   :  { %1031 = vmatpush.bf16.msra.mxu2 %v958_v36  ;;  %1045 = vmatpush.bf16.msra.mxu3 %v966_v14 }
 0x195   :  { %v1057_v44 = vpop.permute.xlu0 %1056  ;;  %v1062_v40 = vpop.permute.xlu1 %1061 }
 0x197   :  { %1032 = vmatmul.bf16.vlgmr.msra.gmra.mxu2 %v1101_v58  ;;  %1106 = vmatmul.msk.bf16.vlgmr.msra.gmra.mxu3 %vm992_vm0, %v1105_v32 }
 0x19d   :  { %v1076_v25 = vpop.permute.xlu0 %1075 }
 0x1d7   :  { %v1005_v48 = vpop.f32.mrf.mxu0 }
 0x1df   :  { %v1007_v1 = vpop.f32.mrf.mxu0 }
 0x20c   :  { %v1019_v31 = vpop.f32.mrf.mxu1 }
 0x20d   :  { %v1020_v41 = vadd.f32 %v1019_v31, %v1005_v48 }
 0x214   :  { %v1021_v42 = vpop.f32.mrf.mxu1 }
 0x215   :  { %v1022_v38 = vadd.f32 %v1021_v42, %v1007_v1 }
 0x21a   :  { %v1033_v22 = vpop.f32.mrf.mxu2  ;;  %v1047_v23 = vpop.f32.mrf.mxu3 }
 0x21b   :  { %v1034_v5 = vadd.f32 %v1033_v22, %v1020_v41 }
 0x21d   :  { %v1048_v61 = vadd.f32 %v1047_v23, %v1034_v5 }
 0x21f   :  { %v1064_v54 = vmul.f32 %v1057_v44, %v1048_v61 }
 0x221   :  { %v1078_v39 = vadd.f32 %v1071_v52, %v1064_v54 }
 0x222   :  { %v1035_v47 = vpop.f32.mrf.mxu2  ;;  %v1049_v10 = vpop.f32.mrf.mxu3 }
 0x223   :  { %v1036_v21 = vadd.f32 %v1035_v47, %v1022_v38  ;;  %v1080_v26 = vmax.f32 %v1078_v39, 0.0 }
 0x225   :  { %v1050_v55 = vadd.f32 %v1049_v10, %v1036_v21 }
 0x227   :  { %v1065_v57 = vmul.f32 %v1062_v40, %v1050_v55 }
 0x229   :  { %v1079_v51 = vadd.f32 %v1076_v25, %v1065_v57 }
 0x22b   :  { %v1081_v11 = vmax.f32 %v1079_v51, 0.0 }
 0x22d   :  { %v1222_v6 = vpack.c.bf16 %v1081_v11, %v1080_v26 }
 0x22f   :  { %1223 = vst [vmem:[%s1958_s6] sm:$0xff] %v1222_v6  }

// kernel: appearance_feature_extractor.11
= control target key start
LH: loop header
LB: loop body
LE: loop exit
PB: predicated region body
PF: predicated region fallthrough
CT: control target
= control target key end

     0   :  { %v530_v6 = vmov 0   ;;  %vm260_vm0 = vcmask 392192   ;;  %s684_s1 = inlined_call_operand.vmem [shape: bf16[432,128], index: 1, kind: input, shape index: {}]   ;;  %s685_s2 = inlined_call_operand.vmem [shape: f32[16,1], index: 2, kind: input, shape index: {}]   ;;  %s686_s0 = inlined_call_operand.vmem [shape: bf16[16,432], index: 0, kind: input, shape index: {}]   ;;  %s687_s3 = inlined_call_operand.vmem [shape: f32[16,1], index: 3, kind: input, shape index: {}]   ;;  %s688_s4 = inlined_call_operand.vmem [shape: bf16[16,128], index: 4, kind: input, shape index: {}]   ;;  %s689_s5 = inlined_call_operand.vmem [shape: bf16[16,128], index: 5, kind: output, shape index: {}]  }
   0x1   :  { %v494_v0 = vld [vmem:[%s684_s1 + $0x38] sm:$0xff]  ;;  %v493_v3 = vld [vmem:[%s684_s1 + $0x30] sm:$0xff]  ;;  %528 = vset.pattern.permute.xlu0 %v530_v6  ;;  %529 = vset.pattern.permute.xlu1 %v530_v6  ;;  %v492_v8 = vld [vmem:[%s684_s1 + $0x28] sm:$0xff] }
   0x2   :  { %v502_v1 = vld [vmem:[%s684_s1 + $0x78] sm:$0xff]  ;;  %264 = vmatpush.bf16.msra.mxu0 %v494_v0  ;;  %v501_v4 = vld [vmem:[%s684_s1 + $0x70] sm:$0xff]  ;;  %v500_v9 = vld [vmem:[%s684_s1 + $0x68] sm:$0xff] }
   0x3   :  { %v510_v2 = vld [vmem:[%s684_s1 + $0xb8] sm:$0xff]  ;;  %278 = vmatpush.bf16.msra.mxu1 %v502_v1  ;;  %v509_v5 = vld [vmem:[%s684_s1 + $0xb0] sm:$0xff]  ;;  %v508_v10 = vld [vmem:[%s684_s1 + $0xa8] sm:$0xff] }
   0x4   :  { %292 = vmatpush.bf16.msra.mxu2 %v510_v2  ;;  %v513_v7 = vld [vmem:[%s684_s1 + $0xd0] sm:$0xff]  ;;  %v512_v11 = vld [vmem:[%s684_s1 + $0xc8] sm:$0xff]  ;;  %v491_v12 = vld [vmem:[%s684_s1 + $0x20] sm:$0xff] }
   0x5   :  { %311 = vmatpush.bf16.msra.mxu3 %v513_v7  ;;  %v499_v13 = vld [vmem:[%s684_s1 + $0x60] sm:$0xff]  ;;  %v515_v17 = vld [vmem:[%s686_s0 + $0xc] sm:$0xf]  ;;  %v374_v18 = vld [vmem:[%s686_s0 + $0x18] sm:$0xf0] }
   0x6   :  { %265 = vmatpush.bf16.msra.mxu0 %v493_v3  ;;  %v507_v14 = vld [vmem:[%s684_s1 + $0xa0] sm:$0xff]  ;;  %v490_v20 = vld [vmem:[%s684_s1 + $0x18] sm:$0xff]  ;;  %v377_v23 = vor.u32 %v515_v17, %v374_v18  ;;  %v321_v24 = vld [vmem:[%s685_s2 + $0x8] sm:$0xff] }
   0x7   :  { %279 = vmatpush.bf16.msra.mxu1 %v501_v4  ;;  %v511_v15 = vld [vmem:[%s684_s1 + $0xc0] sm:$0xff]  ;;  %v498_v21 = vld [vmem:[%s684_s1 + $0x58] sm:$0xff]  ;;  %v489_v25 = vld [vmem:[%s684_s1 + $0x10] sm:$0xff] }
   0x8   :  { %293 = vmatpush.bf16.msra.mxu2 %v509_v5  ;;  %v320_v16 = vld [vmem:[%s685_s2] sm:$0xff]  ;;  %v506_v22 = vld [vmem:[%s684_s1 + $0x98] sm:$0xff]  ;;  %v497_v26 = vld [vmem:[%s684_s1 + $0x50] sm:$0xff] }
   0x9   :  { %312 = vmatpush.bf16.msra.mxu3 %v512_v11  ;;  %324 = vperm.xlu0 %528, %v320_v16   ;;  %v334_v19 = vld [vmem:[%s687_s3] sm:$0xff]  ;;  %v335_v27 = vld [vmem:[%s687_s3 + $0x8] sm:$0xff]  ;;  %v505_v28 = vld [vmem:[%s684_s1 + $0x90] sm:$0xff] }
   0xa   :  { %266 = vmatpush.bf16.msra.mxu0 %v492_v8  ;;  %338 = vperm.xlu1 %529, %v334_v19   ;;  %v488_v29 = vld [vmem:[%s684_s1 + $0x8] sm:$0xff]  ;;  %v487_v32 = vld [vmem:[%s684_s1] sm:$0xff]  ;;  %v516_v35 = vld [vmem:[%s686_s0 + $0xc] sm:$0xf0] }
   0xb   :  { %280 = vmatpush.bf16.msra.mxu1 %v500_v9  ;;  %v496_v30 = vld [vmem:[%s684_s1 + $0x48] sm:$0xff]  ;;  %v495_v33 = vld [vmem:[%s684_s1 + $0x40] sm:$0xff]  ;;  %v366_v37 = vld [vmem:[%s686_s0 + $0x10] sm:$0xf0] }
   0xc   :  { %294 = vmatpush.bf16.msra.mxu2 %v508_v10  ;;  %v504_v31 = vld [vmem:[%s684_s1 + $0x88] sm:$0xff]  ;;  %v364_v34 = vld [vmem:[%s686_s0] sm:$0xf]  ;;  %v514_v36 = vld [vmem:[%s686_s0 + $0x4] sm:$0xf] }
   0xd   :  { %313 = vmatpush.bf16.msra.mxu3 %v511_v15  ;;  %v503_v38 = vld [vmem:[%s684_s1 + $0x80] sm:$0xff]  ;;  %v372_v39 = vld [vmem:[%s686_s0 + $0x8] sm:$0xf]  ;;  %v517_v40 = vld [vmem:[%s686_s0 + $0x14] sm:$0xf0]  ;;  %v365_v41 = vor.u32 %v516_v35, %v364_v34  ;;  %v369_v42 = vor.u32 %v514_v36, %v366_v37 }
   0xe   :  { %267 = vmatpush.bf16.msra.mxu0 %v491_v12  ;;  %v373_v43 = vor.u32 %v517_v40, %v372_v39  ;;  %v519_v59 = vld [vmem:[%s688_s4] sm:$0xff]  }
   0xf   :  { %281 = vmatpush.bf16.msra.mxu1 %v499_v13  ;;  %v520_v0 = vunpack.c.l.bf16 %v519_v59  ;;  %v521_v2 = vunpack.c.h.bf16 %v519_v59 }
  0x10   :  { %295 = vmatpush.bf16.msra.mxu2 %v507_v14  ;;  %486 = vmatmul.msk.bf16.vlgmr.msra.gmra.mxu3 %vm260_vm0, %v377_v23 }
  0x11   :  { %329 = vperm.xlu0 %528, %v321_v24  }
  0x12   :  { %268 = vmatpush.bf16.msra.mxu0 %v490_v20  ;;  %343 = vperm.xlu1 %529, %v335_v27  }
  0x13   :  { %282 = vmatpush.bf16.msra.mxu1 %v498_v21 }
  0x14   :  { %296 = vmatpush.bf16.msra.mxu2 %v506_v22 }
  0x16   :  { %269 = vmatpush.bf16.msra.mxu0 %v489_v25 }
  0x17   :  { %283 = vmatpush.bf16.msra.mxu1 %v497_v26 }
  0x18   :  { %297 = vmatpush.bf16.msra.mxu2 %v505_v28 }
  0x1a   :  { %270 = vmatpush.bf16.msra.mxu0 %v488_v29 }
  0x1b   :  { %284 = vmatpush.bf16.msra.mxu1 %v496_v30 }
  0x1c   :  { %298 = vmatpush.bf16.msra.mxu2 %v504_v31 }
  0x1e   :  { %271 = vmatpush.bf16.msra.mxu0 %v487_v32 }
  0x1f   :  { %285 = vmatpush.bf16.msra.mxu1 %v495_v33 }
  0x20   :  { %299 = vmatpush.bf16.msra.mxu2 %v503_v38 }
  0x21   :  { %272 = vmatmul.bf16.vlgmr.msra.gmra.mxu0 %v365_v41 }
  0x22   :  { %286 = vmatmul.bf16.vlgmr.msra.gmra.mxu1 %v369_v42 }
  0x23   :  { %300 = vmatmul.bf16.vlgmr.msra.gmra.mxu2 %v373_v43 }
  0x7b   :  { %v325_v50 = vpop.permute.xlu0 %324 }
  0x7c   :  { %v339_v51 = vpop.permute.xlu1 %338 }
  0x83   :  { %v330_v62 = vpop.permute.xlu0 %329 }
  0x84   :  { %v344_v3 = vpop.permute.xlu1 %343 }
  0x93   :  { %v315_v47 = vpop.f32.mrf.mxu3 }
  0x9b   :  { %v317_v60 = vpop.f32.mrf.mxu3 }
  0x9e   :  { %v273_v44 = vpop.f32.mrf.mxu0 }
  0x9f   :  { %v287_v45 = vpop.f32.mrf.mxu1 }
  0xa0   :  { %v288_v46 = vadd.f32 %v287_v45, %v273_v44 }
  0xa6   :  { %v301_v48 = vpop.f32.mrf.mxu2  ;;  %v275_v52 = vpop.f32.mrf.mxu0 }
  0xa7   :  { %v302_v49 = vadd.f32 %v301_v48, %v288_v46  ;;  %v289_v53 = vpop.f32.mrf.mxu1 }
  0xa8   :  { %v290_v55 = vadd.f32 %v289_v53, %v275_v52 }
  0xa9   :  { %v316_v54 = vadd.f32 %v315_v47, %v302_v49 }
  0xab   :  { %v332_v57 = vmul.f32 %v325_v50, %v316_v54 }
  0xad   :  { %v346_v63 = vadd.f32 %v339_v51, %v332_v57 }
  0xae   :  { %v303_v56 = vpop.f32.mrf.mxu2 }
  0xaf   :  { %v304_v58 = vadd.f32 %v303_v56, %v290_v55  ;;  %v352_v5 = vadd.f32 %v520_v0, %v346_v63 }
  0xb1   :  { %v318_v61 = vadd.f32 %v317_v60, %v304_v58 }
  0xb3   :  { %v333_v1 = vmul.f32 %v330_v62, %v318_v61 }
  0xb5   :  { %v347_v4 = vadd.f32 %v344_v3, %v333_v1 }
  0xb7   :  { %v353_v6 = vadd.f32 %v521_v2, %v347_v4 }
  0xb9   :  { %v525_v7 = vpack.c.bf16 %v353_v6, %v352_v5 }
  0xbb   :  { %526 = vst [vmem:[%s689_s5] sm:$0xff] %v525_v7  }

</bundles_post_ra>
